<compile_context>
chip_gen: v7x
topology: tpu7x:2x2x1
jax: 0.10.0
libtpu: 0.0.40
codegen_flags: <defaults>
</compile_context>

<pallas_src>
import math
import functools

import jax
import jax.numpy as jnp
from jax import lax
from jax.experimental import pallas as pl
from jax.experimental.pallas import tpu as pltpu

# ---- small synthetic "bert-base-cased"-like config (scaled down) ----
VOCAB = 100
HIDDEN = 128
N_LAYERS = 2
N_HEADS = 2
HEAD_DIM = HIDDEN // N_HEADS          # 64
DHP = 128                             # per-head q/k/v slab padded to one full 128-lane vreg width
INTERMEDIATE = 256
MAX_POS = 16
TYPE_VOCAB = 2
N_CLASSES = 2
CLS_PAD = 128                         # lane-dense classifier output width; logits live in [:, :N_CLASSES]
LN_EPS = 1e-12
DROP_P = 0.3                          # classifier-head dropout from the torch module


# ---------------- in-kernel helpers (pure jnp/lax, f32 math) ----------------
def _layer_norm(y, g, b):
    mu = jnp.mean(y, axis=-1, keepdims=True)
    d = y - mu
    var = jnp.mean(d * d, axis=-1, keepdims=True)
    return d * lax.rsqrt(var + LN_EPS) * g + b


def _gelu(y):
    # TODO(synk): HF BERT uses exact erf-GELU; tanh approximation kept for Mosaic safety.
    return 0.5 * y * (1.0 + jnp.tanh(0.7978845608028654 * (y + 0.044715 * y * y * y)))


def _bf16(x):
    return x.astype(jnp.bfloat16)


# ---------------- single fused forward kernel (one grid step == one batch element) -------------
def _fused_forward_kernel(ids_ref, mask_ref, wte_ref, wpe_ref,
                          wqkv_ref, bqkv_ref, wo_ref,
                          w1_ref, b1_ref, w2_ref,
                          small_l_ref, small_g_ref, headw_ref, drop_ref,
                          o_ref, *, seq):
    scale = 1.0 / math.sqrt(HEAD_DIM)

    # --- embeddings: gather word rows with a one-hot MXU matmul (no HBM round-trip),
    #     add (position + token-type-0) embeddings, then embedding LayerNorm in f32.
    ids = ids_ref[0]                                                        # (S, 1) int32
    onehot = _bf16(jnp.where(
        lax.broadcasted_iota(jnp.int32, (seq, VOCAB), 1) == ids, 1.0, 0.0))  # (S, VOCAB) bf16
    x = jnp.dot(onehot, wte_ref[...], preferred_element_type=jnp.float32)
    x = x + wpe_ref[...].astype(jnp.float32)
    x = _layer_norm(x, small_g_ref[0:1, :], small_g_ref[1:2, :])            # (S, H) f32

    mask3 = mask_ref[...]                                                    # (1, 1, S) additive key mask

    # --- transformer layers (N_LAYERS=2: static unroll is fine; move to a grid axis / fori_loop
    #     with streamed per-layer weight BlockSpecs when scaling toward real bert-base)
    for l in range(N_LAYERS):
        sl = small_l_ref[l]                                                  # (8, H): bo,ln1_g,ln1_b,b2,ln2_g,ln2_b
        xb = jnp.broadcast_to(_bf16(x)[None], (N_HEADS, seq, HIDDEN))

        # fused, head-batched, 128-lane-padded Q|K|V projection -> (NH, S, 3*DHP)
        qkv = lax.dot_general(xb, wqkv_ref[l],
                              (((2,), (1,)), ((0,), (0,))),
                              preferred_element_type=jnp.float32) + bqkv_ref[l]
        q = qkv[:, :, 0 * DHP:1 * DHP]                                       # 128-aligned slabs
        k = qkv[:, :, 1 * DHP:2 * DHP]
        v = qkv[:, :, 2 * DHP:3 * DHP]

        # attention, batched over heads (single dot_general per step; softmax in f32)
        s = lax.dot_general(_bf16(q), _bf16(k), (((2,), (2,)), ((0,), (0,))),
                            preferred_element_type=jnp.float32) * scale      # (NH, S, S)
        s = s + mask3
        s = s - jnp.max(s, axis=-1, keepdims=True)
        p = jnp.exp(s)
        p = p / jnp.sum(p, axis=-1, keepdims=True)
        ctx = lax.dot_general(_bf16(p), _bf16(v), (((2,), (1,)), ((0,), (0,))),
                              preferred_element_type=jnp.float32)            # (NH, S, DHP)

        # output projection (per-head zero-padded slabs, summed over heads) + residual + LN1
        attn_h = lax.dot_general(_bf16(ctx), wo_ref[l], (((2,), (1,)), ((0,), (0,))),
                                 preferred_element_type=jnp.float32)         # (NH, S, H)
        attn = jnp.sum(attn_h, axis=0) + sl[0:1, :]                          # + bo
        x = _layer_norm(attn + x, sl[1:2, :], sl[2:3, :])

        # feed-forward + residual + LN2
        h1 = _gelu(jnp.dot(_bf16(x), w1_ref[l], preferred_element_type=jnp.float32) + b1_ref[l])
        ffn = jnp.dot(_bf16(h1), w2_ref[l], preferred_element_type=jnp.float32) + sl[3:4, :]
        x = _layer_norm(ffn + x, sl[4:5, :], sl[5:6, :])

    # --- pooler on the [CLS] row + dropout + classifier (lane-dense padded logits) ---
    pooled = jnp.tanh(jnp.dot(_bf16(x[0:1, :]), headw_ref[0],
                              preferred_element_type=jnp.float32) + small_g_ref[2:3, :])
    dropped = pooled * drop_ref[0]                                           # inverted-dropout multiplier
    o_ref[0] = (jnp.dot(_bf16(dropped), headw_ref[1],
                        preferred_element_type=jnp.float32) + small_g_ref[3:4, :])


# ---------------- parameter init (deterministic, synthetic) ----------------
def init_params(key):
    keys = iter(jax.random.split(key, 16))

    def nrm(shape, std=0.02):
        return (std * jax.random.normal(next(keys), shape)).astype(jnp.float32)

    L, H, I, NH, DH = N_LAYERS, HIDDEN, INTERMEDIATE, N_HEADS, HEAD_DIM

    wq, wk, wv = nrm((L, H, H)), nrm((L, H, H)), nrm((L, H, H))
    wo = nrm((L, H, H))
    w1, w2 = nrm((L, H, I)), nrm((L, I, H))
    pool_w = nrm((H, H))
    cls_w = nrm((H, N_CLASSES))

    # pack Q|K|V per head into 128-lane-aligned slabs; zero-pad wo's matching input rows
    wqkv = jnp.zeros((L, NH, H, 3 * DHP), jnp.float32)
    wo_pad = jnp.zeros((L, NH, DHP, H), jnp.float32)
    for h in range(NH):
        c = h * DH
        wqkv = wqkv.at[:, h, :, 0 * DHP:0 * DHP + DH].set(wq[:, :, c:c + DH])
        wqkv = wqkv.at[:, h, :, 1 * DHP:1 * DHP + DH].set(wk[:, :, c:c + DH])
        wqkv = wqkv.at[:, h, :, 2 * DHP:2 * DHP + DH].set(wv[:, :, c:c + DH])
        wo_pad = wo_pad.at[:, h, :DH, :].set(wo[:, c:c + DH, :])

    # per-layer (1,H) vectors packed into one (L, 8, H) slab: 0=bo 1=ln1_g 2=ln1_b 3=b2 4=ln2_g 5=ln2_b
    small_l = jnp.zeros((L, 8, H), jnp.float32)
    small_l = small_l.at[:, 1, :].set(1.0).at[:, 4, :].set(1.0)

    # global (1,H) vectors packed into one (8, H) slab: 0=emb_ln_g 1=emb_ln_b 2=pool_b 3=cls_b(padded)
    small_g = jnp.zeros((8, H), jnp.float32)
    small_g = small_g.at[0, :].set(1.0)

    # pooler + classifier weights in one (2, H, 128) slab (classifier padded lane-dense)
    cls_w_pad = jnp.zeros((H, CLS_PAD), jnp.float32).at[:, :N_CLASSES].set(cls_w)
    head_w = jnp.stack([pool_w, cls_w_pad], axis=0)

    return {
        "word_emb": nrm((VOCAB, H)),
        "pos_emb": nrm((MAX_POS, H)),
        "type_emb": nrm((TYPE_VOCAB, H)),
        # MXU operands stored bf16 (half the weight DMA, native MXU bf16 path)
        "wqkv": wqkv.astype(jnp.bfloat16),
        "wo_pad": wo_pad.astype(jnp.bfloat16),
        "w1": w1.astype(jnp.bfloat16),
        "w2": w2.astype(jnp.bfloat16),
        "head_w": head_w.astype(jnp.bfloat16),
        # bias / LayerNorm vectors stay f32 (added to f32 accumulators)
        "bqkv": jnp.zeros((L, NH, 1, 3 * DHP), jnp.float32),
        "b1": jnp.zeros((L, 1, I), jnp.float32),
        "small_l": small_l,
        "small_g": small_g,
    }


# ---------------- full forward: SentimentClassifier.forward ----------------
def sentiment_classifier_forward(params, input_ids, attention_mask,
                                 dropout_seed=0, training=True):
    B, S = input_ids.shape
    H = HIDDEN

    ids3 = input_ids.astype(jnp.int32).reshape(B, S, 1)
    mask3 = ((1.0 - attention_mask.astype(jnp.float32)) * -10000.0).reshape(B, 1, S)

    wte = params["word_emb"].astype(jnp.bfloat16)                            # (VOCAB, H)
    wpe = (params["pos_emb"][:S] + params["type_emb"][0:1]).astype(jnp.bfloat16)  # token_type_ids == 0

    # classifier-head dropout multiplier (train) or identity (eval); generated host-side
    # to avoid pltpu.prng_* (not available in the CPU-interpret path).
    if training:
        keep = jax.random.bernoulli(jax.random.PRNGKey(dropout_seed), 1.0 - DROP_P, (B, 1, H))
        drop_mul = keep.astype(jnp.float32) / (1.0 - DROP_P)
    else:
        drop_mul = jnp.ones((B, 1, H), jnp.float32)

    def batch_spec(shape):   # per-batch block, one grid step per batch element
        return pl.BlockSpec((1,) + shape[1:], lambda b: (b,) + (0,) * (len(shape) - 1))

    def full_spec(shape):    # whole-array block, resident in VMEM across all grid steps
        return pl.BlockSpec(shape, lambda b: (0,) * len(shape))

    operands = (ids3, mask3, wte, wpe,
                params["wqkv"], params["bqkv"], params["wo_pad"],
                params["w1"], params["b1"], params["w2"],
                params["small_l"], params["small_g"], params["head_w"], drop_mul)
    per_batch = {0, 1, 13}
    in_specs = [batch_spec(op.shape) if i in per_batch else full_spec(op.shape)
                for i, op in enumerate(operands)]

    logits_pad = pl.pallas_call(
        functools.partial(_fused_forward_kernel, seq=S),
        grid=(B,),
        out_shape=jax.ShapeDtypeStruct((B, 1, CLS_PAD), jnp.float32),
        in_specs=in_specs,
        out_specs=pl.BlockSpec((1, 1, CLS_PAD), lambda b: (b, 0, 0)),
        compiler_params=pltpu.CompilerParams(
            dimension_semantics=("parallel",),       # v7x: shard batch across both TensorCores
            vmem_limit_bytes=32 * 1024 * 1024),
    )(*operands)

    return logits_pad[:, 0, :N_CLASSES]


if __name__ == "__main__":
    key = jax.random.PRNGKey(0)
    pkey, ikey = jax.random.split(key)
    params = init_params(pkey)

    B, S = 2, 8
    input_ids = jax.random.randint(ikey, (B, S), 0, VOCAB, dtype=jnp.int32)
    attention_mask = jnp.array([[1, 1, 1, 1, 1, 1, 1, 1],
                                [1, 1, 1, 1, 1, 0, 0, 0]], dtype=jnp.int32)

    logits = sentiment_classifier_forward(params, input_ids, attention_mask,
                                          dropout_seed=42, training=True)
    logits = jax.block_until_ready(logits)
    assert logits.shape == (B, N_CLASSES)
    assert bool(jnp.all(jnp.isfinite(logits)))
    print("KERNEL_OK")
</pallas_src>

<mosaic_0001>
module attributes {stable_mosaic.version = 11 : i64} {
  func.func @_fused_forward_kernel(%arg0: i32, %arg1: memref<1x8x1xi32, #tpu.memory_space<vmem>>, %arg2: memref<1x1x8xf32, #tpu.memory_space<vmem>>, %arg3: memref<100x128xbf16, #tpu.memory_space<vmem>>, %arg4: memref<8x128xbf16, #tpu.memory_space<vmem>>, %arg5: memref<2x2x128x384xbf16, #tpu.memory_space<vmem>>, %arg6: memref<2x2x1x384xf32, #tpu.memory_space<vmem>>, %arg7: memref<2x2x128x128xbf16, #tpu.memory_space<vmem>>, %arg8: memref<2x128x256xbf16, #tpu.memory_space<vmem>>, %arg9: memref<2x1x256xf32, #tpu.memory_space<vmem>>, %arg10: memref<2x256x128xbf16, #tpu.memory_space<vmem>>, %arg11: memref<2x8x128xf32, #tpu.memory_space<vmem>>, %arg12: memref<8x128xf32, #tpu.memory_space<vmem>>, %arg13: memref<2x128x128xbf16, #tpu.memory_space<vmem>>, %arg14: memref<1x1x128xf32, #tpu.memory_space<vmem>>, %arg15: memref<1x1x128xf32, #tpu.memory_space<vmem>>) attributes {dimension_semantics = [#tpu.dimension_semantics<parallel>], iteration_bounds = array<i64: 2>, scalar_prefetch = 0 : i64, scratch_operands = 0 : i64, tpu.core_type = #tpu.core_type<tc>, window_params = [{transform_indices = @transform_0, window_bounds = array<i64: 1, 8, 1>}, {transform_indices = @transform_1, window_bounds = array<i64: 1, 1, 8>}, {pipeline_mode = #tpu.pipeline_mode<synchronous>, transform_indices = @transform_2, window_bounds = array<i64: 100, 128>}, {pipeline_mode = #tpu.pipeline_mode<synchronous>, transform_indices = @transform_3, window_bounds = array<i64: 8, 128>}, {pipeline_mode = #tpu.pipeline_mode<synchronous>, transform_indices = @transform_4, window_bounds = array<i64: 2, 2, 128, 384>}, {pipeline_mode = #tpu.pipeline_mode<synchronous>, transform_indices = @transform_5, window_bounds = array<i64: 2, 2, 1, 384>}, {pipeline_mode = #tpu.pipeline_mode<synchronous>, transform_indices = @transform_6, window_bounds = array<i64: 2, 2, 128, 128>}, {pipeline_mode = #tpu.pipeline_mode<synchronous>, transform_indices = @transform_7, window_bounds = array<i64: 2, 128, 256>}, {pipeline_mode = #tpu.pipeline_mode<synchronous>, transform_indices = @transform_8, window_bounds = array<i64: 2, 1, 256>}, {pipeline_mode = #tpu.pipeline_mode<synchronous>, transform_indices = @transform_9, window_bounds = array<i64: 2, 256, 128>}, {pipeline_mode = #tpu.pipeline_mode<synchronous>, transform_indices = @transform_10, window_bounds = array<i64: 2, 8, 128>}, {pipeline_mode = #tpu.pipeline_mode<synchronous>, transform_indices = @transform_11, window_bounds = array<i64: 8, 128>}, {pipeline_mode = #tpu.pipeline_mode<synchronous>, transform_indices = @transform_12, window_bounds = array<i64: 2, 128, 128>}, {transform_indices = @transform_13, window_bounds = array<i64: 1, 1, 128>}, {transform_indices = @transform_14, window_bounds = array<i64: 1, 1, 128>}]} {
    %c0 = arith.constant 0 : index
    %c0_0 = arith.constant 0 : index
    %c0_1 = arith.constant 0 : index
    %0 = vector.load %arg1[%c0, %c0_0, %c0_1] : memref<1x8x1xi32, #tpu.memory_space<vmem>>, vector<1x8x1xi32>
    %1 = vector.shape_cast %0 : vector<1x8x1xi32> to vector<8x1xi32>
    %2 = tpu.iota {dimensions = array<i32: 1>} : vector<8x100xi32>
    %3 = vector.broadcast %1 : vector<8x1xi32> to vector<8x100xi32>
    %4 = arith.cmpi eq, %2, %3 : vector<8x100xi32>
    %cst = arith.constant 1.000000e+00 : f32
    %cst_2 = arith.constant 0.000000e+00 : f32
    %5 = vector.broadcast %cst : f32 to vector<8x100xf32>
    %6 = vector.broadcast %cst_2 : f32 to vector<8x100xf32>
    %7 = arith.select %4, %5, %6 : vector<8x100xi1>, vector<8x100xf32>
    %8 = arith.truncf %7 : vector<8x100xf32> to vector<8x100xbf16>
    %c0_3 = arith.constant 0 : index
    %c0_4 = arith.constant 0 : index
    %9 = vector.load %arg3[%c0_3, %c0_4] : memref<100x128xbf16, #tpu.memory_space<vmem>>, vector<100x128xbf16>
    %cst_5 = arith.constant dense<0.000000e+00> : vector<8x128xf32>
    %10 = tpu.matmul %8, %9, %cst_5 {dimension_numbers = #tpu.dot_dimension_numbers<[1], [0], [0], [1], [0, 0, 1, 1], [], []>} : vector<8x100xbf16>, vector<100x128xbf16>, vector<8x128xf32> -> vector<8x128xf32>
    %c0_6 = arith.constant 0 : index
    %c0_7 = arith.constant 0 : index
    %11 = vector.load %arg4[%c0_6, %c0_7] : memref<8x128xbf16, #tpu.memory_space<vmem>>, vector<8x128xbf16>
    %12 = arith.extf %11 : vector<8x128xbf16> to vector<8x128xf32>
    %13 = arith.addf %10, %12 : vector<8x128xf32>
    %c0_8 = arith.constant 0 : index
    %c0_9 = arith.constant 0 : index
    %14 = vector.load %arg12[%c0_8, %c0_9] : memref<8x128xf32, #tpu.memory_space<vmem>>, vector<1x128xf32>
    %c1 = arith.constant 1 : index
    %c0_10 = arith.constant 0 : index
    %15 = vector.load %arg12[%c1, %c0_10] : memref<8x128xf32, #tpu.memory_space<vmem>>, vector<1x128xf32>
    %cst_11 = arith.constant dense<0.000000e+00> : vector<8xf32>
    %16 = vector.multi_reduction <add>, %13, %cst_11 [1] : vector<8x128xf32> to vector<8xf32>
    %17 = vector.shape_cast %16 : vector<8xf32> to vector<8x1xf32>
    %cst_12 = arith.constant 1.280000e+02 : f32
    %18 = vector.broadcast %cst_12 : f32 to vector<8x1xf32>
    %19 = arith.divf %17, %18 : vector<8x1xf32>
    %20 = vector.broadcast %19 : vector<8x1xf32> to vector<8x128xf32>
    %21 = arith.subf %13, %20 : vector<8x128xf32>
    %22 = arith.mulf %21, %21 : vector<8x128xf32>
    %cst_13 = arith.constant dense<0.000000e+00> : vector<8xf32>
    %23 = vector.multi_reduction <add>, %22, %cst_13 [1] : vector<8x128xf32> to vector<8xf32>
    %24 = vector.shape_cast %23 : vector<8xf32> to vector<8x1xf32>
    %cst_14 = arith.constant 1.280000e+02 : f32
    %25 = vector.broadcast %cst_14 : f32 to vector<8x1xf32>
    %26 = arith.divf %24, %25 : vector<8x1xf32>
    %cst_15 = arith.constant 9.99999996E-13 : f32
    %27 = vector.broadcast %cst_15 : f32 to vector<8x1xf32>
    %28 = arith.addf %26, %27 : vector<8x1xf32>
    %29 = math.rsqrt %28 : vector<8x1xf32>
    %30 = vector.broadcast %29 : vector<8x1xf32> to vector<8x128xf32>
    %31 = arith.mulf %21, %30 : vector<8x128xf32>
    %32 = vector.broadcast %14 : vector<1x128xf32> to vector<8x128xf32>
    %33 = arith.mulf %31, %32 : vector<8x128xf32>
    %34 = vector.broadcast %15 : vector<1x128xf32> to vector<8x128xf32>
    %35 = arith.addf %33, %34 : vector<8x128xf32>
    %c0_16 = arith.constant 0 : index
    %c0_17 = arith.constant 0 : index
    %c0_18 = arith.constant 0 : index
    %36 = vector.load %arg2[%c0_16, %c0_17, %c0_18] : memref<1x1x8xf32, #tpu.memory_space<vmem>>, vector<1x1x8xf32>
    %c0_19 = arith.constant 0 : index
    %c0_20 = arith.constant 0 : index
    %c0_21 = arith.constant 0 : index
    %37 = vector.load %arg11[%c0_19, %c0_20, %c0_21] : memref<2x8x128xf32, #tpu.memory_space<vmem>>, vector<1x8x128xf32>
    %38 = vector.shape_cast %37 : vector<1x8x128xf32> to vector<8x128xf32>
    %39 = arith.truncf %35 : vector<8x128xf32> to vector<8x128xbf16>
    %40 = vector.shape_cast %39 : vector<8x128xbf16> to vector<1x8x128xbf16>
    %41 = vector.shape_cast %40 : vector<1x8x128xbf16> to vector<1x8x128xbf16>
    %42 = vector.broadcast %41 : vector<1x8x128xbf16> to vector<2x8x128xbf16>
    %c0_22 = arith.constant 0 : index
    %c0_23 = arith.constant 0 : index
    %c0_24 = arith.constant 0 : index
    %c0_25 = arith.constant 0 : index
    %43 = vector.load %arg5[%c0_22, %c0_23, %c0_24, %c0_25] : memref<2x2x128x384xbf16, #tpu.memory_space<vmem>>, vector<1x2x128x384xbf16>
    %44 = vector.shape_cast %43 : vector<1x2x128x384xbf16> to vector<2x128x384xbf16>
    %cst_26 = arith.constant dense<0.000000e+00> : vector<2x8x384xf32>
    %45 = tpu.matmul %42, %44, %cst_26 {dimension_numbers = #tpu.dot_dimension_numbers<[2], [1], [1], [2], [0, 0, 0, 1, 1, 2], [0], [0]>} : vector<2x8x128xbf16>, vector<2x128x384xbf16>, vector<2x8x384xf32> -> vector<2x8x384xf32>
    %c0_27 = arith.constant 0 : index
    %c0_28 = arith.constant 0 : index
    %c0_29 = arith.constant 0 : index
    %c0_30 = arith.constant 0 : index
    %46 = vector.load %arg6[%c0_27, %c0_28, %c0_29, %c0_30] : memref<2x2x1x384xf32, #tpu.memory_space<vmem>>, vector<1x2x1x384xf32>
    %47 = vector.shape_cast %46 : vector<1x2x1x384xf32> to vector<2x1x384xf32>
    %48 = vector.broadcast %47 : vector<2x1x384xf32> to vector<2x8x384xf32>
    %49 = arith.addf %45, %48 : vector<2x8x384xf32>
    %50 = vector.extract_strided_slice %49 {offsets = [0, 0, 0], sizes = [2, 8, 128], strides = [1, 1, 1]} : vector<2x8x384xf32> to vector<2x8x128xf32>
    %51 = vector.extract_strided_slice %49 {offsets = [0, 0, 128], sizes = [2, 8, 128], strides = [1, 1, 1]} : vector<2x8x384xf32> to vector<2x8x128xf32>
    %52 = vector.extract_strided_slice %49 {offsets = [0, 0, 256], sizes = [2, 8, 128], strides = [1, 1, 1]} : vector<2x8x384xf32> to vector<2x8x128xf32>
    %53 = arith.truncf %50 : vector<2x8x128xf32> to vector<2x8x128xbf16>
    %54 = arith.truncf %51 : vector<2x8x128xf32> to vector<2x8x128xbf16>
    %cst_31 = arith.constant dense<0.000000e+00> : vector<2x8x8xf32>
    %55 = tpu.matmul %53, %54, %cst_31 {dimension_numbers = #tpu.dot_dimension_numbers<[2], [2], [1], [1], [0, 0, 0, 1, 1, 1], [0], [0]>} : vector<2x8x128xbf16>, vector<2x8x128xbf16>, vector<2x8x8xf32> -> vector<2x8x8xf32>
    %cst_32 = arith.constant 1.250000e-01 : f32
    %56 = vector.broadcast %cst_32 : f32 to vector<2x8x8xf32>
    %57 = arith.mulf %55, %56 : vector<2x8x8xf32>
    %58 = vector.broadcast %36 : vector<1x1x8xf32> to vector<2x8x8xf32>
    %59 = arith.addf %57, %58 : vector<2x8x8xf32>
    %cst_33 = arith.constant dense<0xFF800000> : vector<2x8xf32>
    %60 = vector.multi_reduction <maximumf>, %59, %cst_33 [2] : vector<2x8x8xf32> to vector<2x8xf32>
    %61 = vector.shape_cast %60 : vector<2x8xf32> to vector<2x8x1xf32>
    %62 = vector.broadcast %61 : vector<2x8x1xf32> to vector<2x8x8xf32>
    %63 = arith.subf %59, %62 : vector<2x8x8xf32>
    %64 = math.exp %63 : vector<2x8x8xf32>
    %cst_34 = arith.constant dense<0.000000e+00> : vector<2x8xf32>
    %65 = vector.multi_reduction <add>, %64, %cst_34 [2] : vector<2x8x8xf32> to vector<2x8xf32>
    %66 = vector.shape_cast %65 : vector<2x8xf32> to vector<2x8x1xf32>
    %67 = vector.broadcast %66 : vector<2x8x1xf32> to vector<2x8x8xf32>
    %68 = arith.divf %64, %67 : vector<2x8x8xf32>
    %69 = arith.truncf %68 : vector<2x8x8xf32> to vector<2x8x8xbf16>
    %70 = arith.truncf %52 : vector<2x8x128xf32> to vector<2x8x128xbf16>
    %cst_35 = arith.constant dense<0.000000e+00> : vector<2x8x128xf32>
    %71 = tpu.matmul %69, %70, %cst_35 {dimension_numbers = #tpu.dot_dimension_numbers<[2], [1], [1], [2], [0, 0, 0, 1, 1, 2], [0], [0]>} : vector<2x8x8xbf16>, vector<2x8x128xbf16>, vector<2x8x128xf32> -> vector<2x8x128xf32>
    %72 = arith.truncf %71 : vector<2x8x128xf32> to vector<2x8x128xbf16>
    %c0_36 = arith.constant 0 : index
    %c0_37 = arith.constant 0 : index
    %c0_38 = arith.constant 0 : index
    %c0_39 = arith.constant 0 : index
    %73 = vector.load %arg7[%c0_36, %c0_37, %c0_38, %c0_39] : memref<2x2x128x128xbf16, #tpu.memory_space<vmem>>, vector<1x2x128x128xbf16>
    %74 = vector.shape_cast %73 : vector<1x2x128x128xbf16> to vector<2x128x128xbf16>
    %cst_40 = arith.constant dense<0.000000e+00> : vector<2x8x128xf32>
    %75 = tpu.matmul %72, %74, %cst_40 {dimension_numbers = #tpu.dot_dimension_numbers<[2], [1], [1], [2], [0, 0, 0, 1, 1, 2], [0], [0]>} : vector<2x8x128xbf16>, vector<2x128x128xbf16>, vector<2x8x128xf32> -> vector<2x8x128xf32>
    %cst_41 = arith.constant dense<0.000000e+00> : vector<8x128xf32>
    %76 = vector.multi_reduction <add>, %75, %cst_41 [0] : vector<2x8x128xf32> to vector<8x128xf32>
    %77 = vector.extract_strided_slice %38 {offsets = [0, 0], sizes = [1, 128], strides = [1, 1]} : vector<8x128xf32> to vector<1x128xf32>
    %78 = vector.broadcast %77 : vector<1x128xf32> to vector<8x128xf32>
    %79 = arith.addf %76, %78 : vector<8x128xf32>
    %80 = arith.addf %79, %35 : vector<8x128xf32>
    %81 = vector.extract_strided_slice %38 {offsets = [1, 0], sizes = [1, 128], strides = [1, 1]} : vector<8x128xf32> to vector<1x128xf32>
    %82 = vector.extract_strided_slice %38 {offsets = [2, 0], sizes = [1, 128], strides = [1, 1]} : vector<8x128xf32> to vector<1x128xf32>
    %cst_42 = arith.constant dense<0.000000e+00> : vector<8xf32>
    %83 = vector.multi_reduction <add>, %80, %cst_42 [1] : vector<8x128xf32> to vector<8xf32>
    %84 = vector.shape_cast %83 : vector<8xf32> to vector<8x1xf32>
    %cst_43 = arith.constant 1.280000e+02 : f32
    %85 = vector.broadcast %cst_43 : f32 to vector<8x1xf32>
    %86 = arith.divf %84, %85 : vector<8x1xf32>
    %87 = vector.broadcast %86 : vector<8x1xf32> to vector<8x128xf32>
    %88 = arith.subf %80, %87 : vector<8x128xf32>
    %89 = arith.mulf %88, %88 : vector<8x128xf32>
    %cst_44 = arith.constant dense<0.000000e+00> : vector<8xf32>
    %90 = vector.multi_reduction <add>, %89, %cst_44 [1] : vector<8x128xf32> to vector<8xf32>
    %91 = vector.shape_cast %90 : vector<8xf32> to vector<8x1xf32>
    %cst_45 = arith.constant 1.280000e+02 : f32
    %92 = vector.broadcast %cst_45 : f32 to vector<8x1xf32>
    %93 = arith.divf %91, %92 : vector<8x1xf32>
    %cst_46 = arith.constant 9.99999996E-13 : f32
    %94 = vector.broadcast %cst_46 : f32 to vector<8x1xf32>
    %95 = arith.addf %93, %94 : vector<8x1xf32>
    %96 = math.rsqrt %95 : vector<8x1xf32>
    %97 = vector.broadcast %96 : vector<8x1xf32> to vector<8x128xf32>
    %98 = arith.mulf %88, %97 : vector<8x128xf32>
    %99 = vector.broadcast %81 : vector<1x128xf32> to vector<8x128xf32>
    %100 = arith.mulf %98, %99 : vector<8x128xf32>
    %101 = vector.broadcast %82 : vector<1x128xf32> to vector<8x128xf32>
    %102 = arith.addf %100, %101 : vector<8x128xf32>
    %103 = arith.truncf %102 : vector<8x128xf32> to vector<8x128xbf16>
    %c0_47 = arith.constant 0 : index
    %c0_48 = arith.constant 0 : index
    %c0_49 = arith.constant 0 : index
    %104 = vector.load %arg8[%c0_47, %c0_48, %c0_49] : memref<2x128x256xbf16, #tpu.memory_space<vmem>>, vector<1x128x256xbf16>
    %105 = vector.shape_cast %104 : vector<1x128x256xbf16> to vector<128x256xbf16>
    %cst_50 = arith.constant dense<0.000000e+00> : vector<8x256xf32>
    %106 = tpu.matmul %103, %105, %cst_50 {dimension_numbers = #tpu.dot_dimension_numbers<[1], [0], [0], [1], [0, 0, 1, 1], [], []>} : vector<8x128xbf16>, vector<128x256xbf16>, vector<8x256xf32> -> vector<8x256xf32>
    %c0_51 = arith.constant 0 : index
    %c0_52 = arith.constant 0 : index
    %c0_53 = arith.constant 0 : index
    %107 = vector.load %arg9[%c0_51, %c0_52, %c0_53] : memref<2x1x256xf32, #tpu.memory_space<vmem>>, vector<1x1x256xf32>
    %108 = vector.shape_cast %107 : vector<1x1x256xf32> to vector<1x256xf32>
    %109 = vector.broadcast %108 : vector<1x256xf32> to vector<8x256xf32>
    %110 = arith.addf %106, %109 : vector<8x256xf32>
    %cst_54 = arith.constant 5.000000e-01 : f32
    %111 = vector.broadcast %cst_54 : f32 to vector<8x256xf32>
    %112 = arith.mulf %111, %110 : vector<8x256xf32>
    %cst_55 = arith.constant 4.471500e-02 : f32
    %113 = vector.broadcast %cst_55 : f32 to vector<8x256xf32>
    %114 = arith.mulf %113, %110 : vector<8x256xf32>
    %115 = arith.mulf %114, %110 : vector<8x256xf32>
    %116 = arith.mulf %115, %110 : vector<8x256xf32>
    %117 = arith.addf %110, %116 : vector<8x256xf32>
    %cst_56 = arith.constant 0.797884583 : f32
    %118 = vector.broadcast %cst_56 : f32 to vector<8x256xf32>
    %119 = arith.mulf %118, %117 : vector<8x256xf32>
    %120 = math.tanh %119 : vector<8x256xf32>
    %cst_57 = arith.constant 1.000000e+00 : f32
    %121 = vector.broadcast %cst_57 : f32 to vector<8x256xf32>
    %122 = arith.addf %121, %120 : vector<8x256xf32>
    %123 = arith.mulf %112, %122 : vector<8x256xf32>
    %124 = arith.truncf %123 : vector<8x256xf32> to vector<8x256xbf16>
    %c0_58 = arith.constant 0 : index
    %c0_59 = arith.constant 0 : index
    %c0_60 = arith.constant 0 : index
    %125 = vector.load %arg10[%c0_58, %c0_59, %c0_60] : memref<2x256x128xbf16, #tpu.memory_space<vmem>>, vector<1x256x128xbf16>
    %126 = vector.shape_cast %125 : vector<1x256x128xbf16> to vector<256x128xbf16>
    %cst_61 = arith.constant dense<0.000000e+00> : vector<8x128xf32>
    %127 = tpu.matmul %124, %126, %cst_61 {dimension_numbers = #tpu.dot_dimension_numbers<[1], [0], [0], [1], [0, 0, 1, 1], [], []>} : vector<8x256xbf16>, vector<256x128xbf16>, vector<8x128xf32> -> vector<8x128xf32>
    %128 = vector.extract_strided_slice %38 {offsets = [3, 0], sizes = [1, 128], strides = [1, 1]} : vector<8x128xf32> to vector<1x128xf32>
    %129 = vector.broadcast %128 : vector<1x128xf32> to vector<8x128xf32>
    %130 = arith.addf %127, %129 : vector<8x128xf32>
    %131 = arith.addf %130, %102 : vector<8x128xf32>
    %132 = vector.extract_strided_slice %38 {offsets = [4, 0], sizes = [1, 128], strides = [1, 1]} : vector<8x128xf32> to vector<1x128xf32>
    %133 = vector.extract_strided_slice %38 {offsets = [5, 0], sizes = [1, 128], strides = [1, 1]} : vector<8x128xf32> to vector<1x128xf32>
    %cst_62 = arith.constant dense<0.000000e+00> : vector<8xf32>
    %134 = vector.multi_reduction <add>, %131, %cst_62 [1] : vector<8x128xf32> to vector<8xf32>
    %135 = vector.shape_cast %134 : vector<8xf32> to vector<8x1xf32>
    %cst_63 = arith.constant 1.280000e+02 : f32
    %136 = vector.broadcast %cst_63 : f32 to vector<8x1xf32>
    %137 = arith.divf %135, %136 : vector<8x1xf32>
    %138 = vector.broadcast %137 : vector<8x1xf32> to vector<8x128xf32>
    %139 = arith.subf %131, %138 : vector<8x128xf32>
    %140 = arith.mulf %139, %139 : vector<8x128xf32>
    %cst_64 = arith.constant dense<0.000000e+00> : vector<8xf32>
    %141 = vector.multi_reduction <add>, %140, %cst_64 [1] : vector<8x128xf32> to vector<8xf32>
    %142 = vector.shape_cast %141 : vector<8xf32> to vector<8x1xf32>
    %cst_65 = arith.constant 1.280000e+02 : f32
    %143 = vector.broadcast %cst_65 : f32 to vector<8x1xf32>
    %144 = arith.divf %142, %143 : vector<8x1xf32>
    %cst_66 = arith.constant 9.99999996E-13 : f32
    %145 = vector.broadcast %cst_66 : f32 to vector<8x1xf32>
    %146 = arith.addf %144, %145 : vector<8x1xf32>
    %147 = math.rsqrt %146 : vector<8x1xf32>
    %148 = vector.broadcast %147 : vector<8x1xf32> to vector<8x128xf32>
    %149 = arith.mulf %139, %148 : vector<8x128xf32>
    %150 = vector.broadcast %132 : vector<1x128xf32> to vector<8x128xf32>
    %151 = arith.mulf %149, %150 : vector<8x128xf32>
    %152 = vector.broadcast %133 : vector<1x128xf32> to vector<8x128xf32>
    %153 = arith.addf %151, %152 : vector<8x128xf32>
    %c1_67 = arith.constant 1 : index
    %c0_68 = arith.constant 0 : index
    %c0_69 = arith.constant 0 : index
    %154 = vector.load %arg11[%c1_67, %c0_68, %c0_69] : memref<2x8x128xf32, #tpu.memory_space<vmem>>, vector<1x8x128xf32>
    %155 = vector.shape_cast %154 : vector<1x8x128xf32> to vector<8x128xf32>
    %156 = arith.truncf %153 : vector<8x128xf32> to vector<8x128xbf16>
    %157 = vector.shape_cast %156 : vector<8x128xbf16> to vector<1x8x128xbf16>
    %158 = vector.shape_cast %157 : vector<1x8x128xbf16> to vector<1x8x128xbf16>
    %159 = vector.broadcast %158 : vector<1x8x128xbf16> to vector<2x8x128xbf16>
    %c1_70 = arith.constant 1 : index
    %c0_71 = arith.constant 0 : index
    %c0_72 = arith.constant 0 : index
    %c0_73 = arith.constant 0 : index
    %160 = vector.load %arg5[%c1_70, %c0_71, %c0_72, %c0_73] : memref<2x2x128x384xbf16, #tpu.memory_space<vmem>>, vector<1x2x128x384xbf16>
    %161 = vector.shape_cast %160 : vector<1x2x128x384xbf16> to vector<2x128x384xbf16>
    %cst_74 = arith.constant dense<0.000000e+00> : vector<2x8x384xf32>
    %162 = tpu.matmul %159, %161, %cst_74 {dimension_numbers = #tpu.dot_dimension_numbers<[2], [1], [1], [2], [0, 0, 0, 1, 1, 2], [0], [0]>} : vector<2x8x128xbf16>, vector<2x128x384xbf16>, vector<2x8x384xf32> -> vector<2x8x384xf32>
    %c1_75 = arith.constant 1 : index
    %c0_76 = arith.constant 0 : index
    %c0_77 = arith.constant 0 : index
    %c0_78 = arith.constant 0 : index
    %163 = vector.load %arg6[%c1_75, %c0_76, %c0_77, %c0_78] : memref<2x2x1x384xf32, #tpu.memory_space<vmem>>, vector<1x2x1x384xf32>
    %164 = vector.shape_cast %163 : vector<1x2x1x384xf32> to vector<2x1x384xf32>
    %165 = vector.broadcast %164 : vector<2x1x384xf32> to vector<2x8x384xf32>
    %166 = arith.addf %162, %165 : vector<2x8x384xf32>
    %167 = vector.extract_strided_slice %166 {offsets = [0, 0, 0], sizes = [2, 8, 128], strides = [1, 1, 1]} : vector<2x8x384xf32> to vector<2x8x128xf32>
    %168 = vector.extract_strided_slice %166 {offsets = [0, 0, 128], sizes = [2, 8, 128], strides = [1, 1, 1]} : vector<2x8x384xf32> to vector<2x8x128xf32>
    %169 = vector.extract_strided_slice %166 {offsets = [0, 0, 256], sizes = [2, 8, 128], strides = [1, 1, 1]} : vector<2x8x384xf32> to vector<2x8x128xf32>
    %170 = arith.truncf %167 : vector<2x8x128xf32> to vector<2x8x128xbf16>
    %171 = arith.truncf %168 : vector<2x8x128xf32> to vector<2x8x128xbf16>
    %cst_79 = arith.constant dense<0.000000e+00> : vector<2x8x8xf32>
    %172 = tpu.matmul %170, %171, %cst_79 {dimension_numbers = #tpu.dot_dimension_numbers<[2], [2], [1], [1], [0, 0, 0, 1, 1, 1], [0], [0]>} : vector<2x8x128xbf16>, vector<2x8x128xbf16>, vector<2x8x8xf32> -> vector<2x8x8xf32>
    %cst_80 = arith.constant 1.250000e-01 : f32
    %173 = vector.broadcast %cst_80 : f32 to vector<2x8x8xf32>
    %174 = arith.mulf %172, %173 : vector<2x8x8xf32>
    %175 = vector.broadcast %36 : vector<1x1x8xf32> to vector<2x8x8xf32>
    %176 = arith.addf %174, %175 : vector<2x8x8xf32>
    %cst_81 = arith.constant dense<0xFF800000> : vector<2x8xf32>
    %177 = vector.multi_reduction <maximumf>, %176, %cst_81 [2] : vector<2x8x8xf32> to vector<2x8xf32>
    %178 = vector.shape_cast %177 : vector<2x8xf32> to vector<2x8x1xf32>
    %179 = vector.broadcast %178 : vector<2x8x1xf32> to vector<2x8x8xf32>
    %180 = arith.subf %176, %179 : vector<2x8x8xf32>
    %181 = math.exp %180 : vector<2x8x8xf32>
    %cst_82 = arith.constant dense<0.000000e+00> : vector<2x8xf32>
    %182 = vector.multi_reduction <add>, %181, %cst_82 [2] : vector<2x8x8xf32> to vector<2x8xf32>
    %183 = vector.shape_cast %182 : vector<2x8xf32> to vector<2x8x1xf32>
    %184 = vector.broadcast %183 : vector<2x8x1xf32> to vector<2x8x8xf32>
    %185 = arith.divf %181, %184 : vector<2x8x8xf32>
    %186 = arith.truncf %185 : vector<2x8x8xf32> to vector<2x8x8xbf16>
    %187 = arith.truncf %169 : vector<2x8x128xf32> to vector<2x8x128xbf16>
    %cst_83 = arith.constant dense<0.000000e+00> : vector<2x8x128xf32>
    %188 = tpu.matmul %186, %187, %cst_83 {dimension_numbers = #tpu.dot_dimension_numbers<[2], [1], [1], [2], [0, 0, 0, 1, 1, 2], [0], [0]>} : vector<2x8x8xbf16>, vector<2x8x128xbf16>, vector<2x8x128xf32> -> vector<2x8x128xf32>
    %189 = arith.truncf %188 : vector<2x8x128xf32> to vector<2x8x128xbf16>
    %c1_84 = arith.constant 1 : index
    %c0_85 = arith.constant 0 : index
    %c0_86 = arith.constant 0 : index
    %c0_87 = arith.constant 0 : index
    %190 = vector.load %arg7[%c1_84, %c0_85, %c0_86, %c0_87] : memref<2x2x128x128xbf16, #tpu.memory_space<vmem>>, vector<1x2x128x128xbf16>
    %191 = vector.shape_cast %190 : vector<1x2x128x128xbf16> to vector<2x128x128xbf16>
    %cst_88 = arith.constant dense<0.000000e+00> : vector<2x8x128xf32>
    %192 = tpu.matmul %189, %191, %cst_88 {dimension_numbers = #tpu.dot_dimension_numbers<[2], [1], [1], [2], [0, 0, 0, 1, 1, 2], [0], [0]>} : vector<2x8x128xbf16>, vector<2x128x128xbf16>, vector<2x8x128xf32> -> vector<2x8x128xf32>
    %cst_89 = arith.constant dense<0.000000e+00> : vector<8x128xf32>
    %193 = vector.multi_reduction <add>, %192, %cst_89 [0] : vector<2x8x128xf32> to vector<8x128xf32>
    %194 = vector.extract_strided_slice %155 {offsets = [0, 0], sizes = [1, 128], strides = [1, 1]} : vector<8x128xf32> to vector<1x128xf32>
    %195 = vector.broadcast %194 : vector<1x128xf32> to vector<8x128xf32>
    %196 = arith.addf %193, %195 : vector<8x128xf32>
    %197 = arith.addf %196, %153 : vector<8x128xf32>
    %198 = vector.extract_strided_slice %155 {offsets = [1, 0], sizes = [1, 128], strides = [1, 1]} : vector<8x128xf32> to vector<1x128xf32>
    %199 = vector.extract_strided_slice %155 {offsets = [2, 0], sizes = [1, 128], strides = [1, 1]} : vector<8x128xf32> to vector<1x128xf32>
    %cst_90 = arith.constant dense<0.000000e+00> : vector<8xf32>
    %200 = vector.multi_reduction <add>, %197, %cst_90 [1] : vector<8x128xf32> to vector<8xf32>
    %201 = vector.shape_cast %200 : vector<8xf32> to vector<8x1xf32>
    %cst_91 = arith.constant 1.280000e+02 : f32
    %202 = vector.broadcast %cst_91 : f32 to vector<8x1xf32>
    %203 = arith.divf %201, %202 : vector<8x1xf32>
    %204 = vector.broadcast %203 : vector<8x1xf32> to vector<8x128xf32>
    %205 = arith.subf %197, %204 : vector<8x128xf32>
    %206 = arith.mulf %205, %205 : vector<8x128xf32>
    %cst_92 = arith.constant dense<0.000000e+00> : vector<8xf32>
    %207 = vector.multi_reduction <add>, %206, %cst_92 [1] : vector<8x128xf32> to vector<8xf32>
    %208 = vector.shape_cast %207 : vector<8xf32> to vector<8x1xf32>
    %cst_93 = arith.constant 1.280000e+02 : f32
    %209 = vector.broadcast %cst_93 : f32 to vector<8x1xf32>
    %210 = arith.divf %208, %209 : vector<8x1xf32>
    %cst_94 = arith.constant 9.99999996E-13 : f32
    %211 = vector.broadcast %cst_94 : f32 to vector<8x1xf32>
    %212 = arith.addf %210, %211 : vector<8x1xf32>
    %213 = math.rsqrt %212 : vector<8x1xf32>
    %214 = vector.broadcast %213 : vector<8x1xf32> to vector<8x128xf32>
    %215 = arith.mulf %205, %214 : vector<8x128xf32>
    %216 = vector.broadcast %198 : vector<1x128xf32> to vector<8x128xf32>
    %217 = arith.mulf %215, %216 : vector<8x128xf32>
    %218 = vector.broadcast %199 : vector<1x128xf32> to vector<8x128xf32>
    %219 = arith.addf %217, %218 : vector<8x128xf32>
    %220 = arith.truncf %219 : vector<8x128xf32> to vector<8x128xbf16>
    %c1_95 = arith.constant 1 : index
    %c0_96 = arith.constant 0 : index
    %c0_97 = arith.constant 0 : index
    %221 = vector.load %arg8[%c1_95, %c0_96, %c0_97] : memref<2x128x256xbf16, #tpu.memory_space<vmem>>, vector<1x128x256xbf16>
    %222 = vector.shape_cast %221 : vector<1x128x256xbf16> to vector<128x256xbf16>
    %cst_98 = arith.constant dense<0.000000e+00> : vector<8x256xf32>
    %223 = tpu.matmul %220, %222, %cst_98 {dimension_numbers = #tpu.dot_dimension_numbers<[1], [0], [0], [1], [0, 0, 1, 1], [], []>} : vector<8x128xbf16>, vector<128x256xbf16>, vector<8x256xf32> -> vector<8x256xf32>
    %c1_99 = arith.constant 1 : index
    %c0_100 = arith.constant 0 : index
    %c0_101 = arith.constant 0 : index
    %224 = vector.load %arg9[%c1_99, %c0_100, %c0_101] : memref<2x1x256xf32, #tpu.memory_space<vmem>>, vector<1x1x256xf32>
    %225 = vector.shape_cast %224 : vector<1x1x256xf32> to vector<1x256xf32>
    %226 = vector.broadcast %225 : vector<1x256xf32> to vector<8x256xf32>
    %227 = arith.addf %223, %226 : vector<8x256xf32>
    %cst_102 = arith.constant 5.000000e-01 : f32
    %228 = vector.broadcast %cst_102 : f32 to vector<8x256xf32>
    %229 = arith.mulf %228, %227 : vector<8x256xf32>
    %cst_103 = arith.constant 4.471500e-02 : f32
    %230 = vector.broadcast %cst_103 : f32 to vector<8x256xf32>
    %231 = arith.mulf %230, %227 : vector<8x256xf32>
    %232 = arith.mulf %231, %227 : vector<8x256xf32>
    %233 = arith.mulf %232, %227 : vector<8x256xf32>
    %234 = arith.addf %227, %233 : vector<8x256xf32>
    %cst_104 = arith.constant 0.797884583 : f32
    %235 = vector.broadcast %cst_104 : f32 to vector<8x256xf32>
    %236 = arith.mulf %235, %234 : vector<8x256xf32>
    %237 = math.tanh %236 : vector<8x256xf32>
    %cst_105 = arith.constant 1.000000e+00 : f32
    %238 = vector.broadcast %cst_105 : f32 to vector<8x256xf32>
    %239 = arith.addf %238, %237 : vector<8x256xf32>
    %240 = arith.mulf %229, %239 : vector<8x256xf32>
    %241 = arith.truncf %240 : vector<8x256xf32> to vector<8x256xbf16>
    %c1_106 = arith.constant 1 : index
    %c0_107 = arith.constant 0 : index
    %c0_108 = arith.constant 0 : index
    %242 = vector.load %arg10[%c1_106, %c0_107, %c0_108] : memref<2x256x128xbf16, #tpu.memory_space<vmem>>, vector<1x256x128xbf16>
    %243 = vector.shape_cast %242 : vector<1x256x128xbf16> to vector<256x128xbf16>
    %cst_109 = arith.constant dense<0.000000e+00> : vector<8x128xf32>
    %244 = tpu.matmul %241, %243, %cst_109 {dimension_numbers = #tpu.dot_dimension_numbers<[1], [0], [0], [1], [0, 0, 1, 1], [], []>} : vector<8x256xbf16>, vector<256x128xbf16>, vector<8x128xf32> -> vector<8x128xf32>
    %245 = vector.extract_strided_slice %155 {offsets = [3, 0], sizes = [1, 128], strides = [1, 1]} : vector<8x128xf32> to vector<1x128xf32>
    %246 = vector.broadcast %245 : vector<1x128xf32> to vector<8x128xf32>
    %247 = arith.addf %244, %246 : vector<8x128xf32>
    %248 = arith.addf %247, %219 : vector<8x128xf32>
    %249 = vector.extract_strided_slice %155 {offsets = [4, 0], sizes = [1, 128], strides = [1, 1]} : vector<8x128xf32> to vector<1x128xf32>
    %250 = vector.extract_strided_slice %155 {offsets = [5, 0], sizes = [1, 128], strides = [1, 1]} : vector<8x128xf32> to vector<1x128xf32>
    %cst_110 = arith.constant dense<0.000000e+00> : vector<8xf32>
    %251 = vector.multi_reduction <add>, %248, %cst_110 [1] : vector<8x128xf32> to vector<8xf32>
    %252 = vector.shape_cast %251 : vector<8xf32> to vector<8x1xf32>
    %cst_111 = arith.constant 1.280000e+02 : f32
    %253 = vector.broadcast %cst_111 : f32 to vector<8x1xf32>
    %254 = arith.divf %252, %253 : vector<8x1xf32>
    %255 = vector.broadcast %254 : vector<8x1xf32> to vector<8x128xf32>
    %256 = arith.subf %248, %255 : vector<8x128xf32>
    %257 = arith.mulf %256, %256 : vector<8x128xf32>
    %cst_112 = arith.constant dense<0.000000e+00> : vector<8xf32>
    %258 = vector.multi_reduction <add>, %257, %cst_112 [1] : vector<8x128xf32> to vector<8xf32>
    %259 = vector.shape_cast %258 : vector<8xf32> to vector<8x1xf32>
    %cst_113 = arith.constant 1.280000e+02 : f32
    %260 = vector.broadcast %cst_113 : f32 to vector<8x1xf32>
    %261 = arith.divf %259, %260 : vector<8x1xf32>
    %cst_114 = arith.constant 9.99999996E-13 : f32
    %262 = vector.broadcast %cst_114 : f32 to vector<8x1xf32>
    %263 = arith.addf %261, %262 : vector<8x1xf32>
    %264 = math.rsqrt %263 : vector<8x1xf32>
    %265 = vector.broadcast %264 : vector<8x1xf32> to vector<8x128xf32>
    %266 = arith.mulf %256, %265 : vector<8x128xf32>
    %267 = vector.broadcast %249 : vector<1x128xf32> to vector<8x128xf32>
    %268 = arith.mulf %266, %267 : vector<8x128xf32>
    %269 = vector.broadcast %250 : vector<1x128xf32> to vector<8x128xf32>
    %270 = arith.addf %268, %269 : vector<8x128xf32>
    %271 = vector.extract_strided_slice %270 {offsets = [0, 0], sizes = [1, 128], strides = [1, 1]} : vector<8x128xf32> to vector<1x128xf32>
    %272 = arith.truncf %271 : vector<1x128xf32> to vector<1x128xbf16>
    %c0_115 = arith.constant 0 : index
    %c0_116 = arith.constant 0 : index
    %c0_117 = arith.constant 0 : index
    %273 = vector.load %arg13[%c0_115, %c0_116, %c0_117] : memref<2x128x128xbf16, #tpu.memory_space<vmem>>, vector<1x128x128xbf16>
    %274 = vector.shape_cast %273 : vector<1x128x128xbf16> to vector<128x128xbf16>
    %cst_118 = arith.constant dense<0.000000e+00> : vector<1x128xf32>
    %275 = tpu.matmul %272, %274, %cst_118 {dimension_numbers = #tpu.dot_dimension_numbers<[1], [0], [0], [1], [0, 0, 1, 1], [], []>} : vector<1x128xbf16>, vector<128x128xbf16>, vector<1x128xf32> -> vector<1x128xf32>
    %c2 = arith.constant 2 : index
    %c0_119 = arith.constant 0 : index
    %276 = vector.load %arg12[%c2, %c0_119] : memref<8x128xf32, #tpu.memory_space<vmem>>, vector<1x128xf32>
    %277 = arith.addf %275, %276 : vector<1x128xf32>
    %278 = math.tanh %277 : vector<1x128xf32>
    %c0_120 = arith.constant 0 : index
    %c0_121 = arith.constant 0 : index
    %c0_122 = arith.constant 0 : index
    %279 = vector.load %arg14[%c0_120, %c0_121, %c0_122] : memref<1x1x128xf32, #tpu.memory_space<vmem>>, vector<1x1x128xf32>
    %280 = vector.shape_cast %279 : vector<1x1x128xf32> to vector<1x128xf32>
    %281 = arith.mulf %278, %280 : vector<1x128xf32>
    %282 = arith.truncf %281 : vector<1x128xf32> to vector<1x128xbf16>
    %c1_123 = arith.constant 1 : index
    %c0_124 = arith.constant 0 : index
    %c0_125 = arith.constant 0 : index
    %283 = vector.load %arg13[%c1_123, %c0_124, %c0_125] : memref<2x128x128xbf16, #tpu.memory_space<vmem>>, vector<1x128x128xbf16>
    %284 = vector.shape_cast %283 : vector<1x128x128xbf16> to vector<128x128xbf16>
    %cst_126 = arith.constant dense<0.000000e+00> : vector<1x128xf32>
    %285 = tpu.matmul %282, %284, %cst_126 {dimension_numbers = #tpu.dot_dimension_numbers<[1], [0], [0], [1], [0, 0, 1, 1], [], []>} : vector<1x128xbf16>, vector<128x128xbf16>, vector<1x128xf32> -> vector<1x128xf32>
    %c3 = arith.constant 3 : index
    %c0_127 = arith.constant 0 : index
    %286 = vector.load %arg12[%c3, %c0_127] : memref<8x128xf32, #tpu.memory_space<vmem>>, vector<1x128xf32>
    %287 = arith.addf %285, %286 : vector<1x128xf32>
    %c0_128 = arith.constant 0 : index
    %c0_129 = arith.constant 0 : index
    %c0_130 = arith.constant 0 : index
    %288 = vector.load %arg15[%c0_128, %c0_129, %c0_130] : memref<1x1x128xf32, #tpu.memory_space<vmem>>, vector<1x1x128xf32>
    %289 = vector.shape_cast %288 : vector<1x1x128xf32> to vector<1x128xf32>
    %290 = vector.shape_cast %287 : vector<1x128xf32> to vector<1x1x128xf32>
    tpu.vector_store %arg15[%c0_128, %c0_129, %c0_130], %290 {strides = array<i32>} : memref<1x1x128xf32, #tpu.memory_space<vmem>>, vector<1x1x128xf32>,
    return
  }
  func.func @transform_0(%arg0: i32) -> (i32, i32, i32) {
    %c0_i32 = arith.constant 0 : i32
    %c0_i32_0 = arith.constant 0 : i32
    %c0_i32_1 = arith.constant 0 : i32
    return %arg0, %c0_i32, %c0_i32_0 : i32, i32, i32
  }
  func.func @transform_1(%arg0: i32) -> (i32, i32, i32) {
    %c0_i32 = arith.constant 0 : i32
    %c0_i32_0 = arith.constant 0 : i32
    %c0_i32_1 = arith.constant 0 : i32
    return %arg0, %c0_i32, %c0_i32_0 : i32, i32, i32
  }
  func.func @transform_2(%arg0: i32) -> (i32, i32) {
    %c0_i32 = arith.constant 0 : i32
    %c0_i32_0 = arith.constant 0 : i32
    %c0_i32_1 = arith.constant 0 : i32
    return %c0_i32, %c0_i32_0 : i32, i32
  }
  func.func @transform_3(%arg0: i32) -> (i32, i32) {
    %c0_i32 = arith.constant 0 : i32
    %c0_i32_0 = arith.constant 0 : i32
    %c0_i32_1 = arith.constant 0 : i32
    return %c0_i32, %c0_i32_0 : i32, i32
  }
  func.func @transform_4(%arg0: i32) -> (i32, i32, i32, i32) {
    %c0_i32 = arith.constant 0 : i32
    %c0_i32_0 = arith.constant 0 : i32
    %c0_i32_1 = arith.constant 0 : i32
    %c0_i32_2 = arith.constant 0 : i32
    %c0_i32_3 = arith.constant 0 : i32
    return %c0_i32, %c0_i32_0, %c0_i32_1, %c0_i32_2 : i32, i32, i32, i32
  }
  func.func @transform_5(%arg0: i32) -> (i32, i32, i32, i32) {
    %c0_i32 = arith.constant 0 : i32
    %c0_i32_0 = arith.constant 0 : i32
    %c0_i32_1 = arith.constant 0 : i32
    %c0_i32_2 = arith.constant 0 : i32
    %c0_i32_3 = arith.constant 0 : i32
    return %c0_i32, %c0_i32_0, %c0_i32_1, %c0_i32_2 : i32, i32, i32, i32
  }
  func.func @transform_6(%arg0: i32) -> (i32, i32, i32, i32) {
    %c0_i32 = arith.constant 0 : i32
    %c0_i32_0 = arith.constant 0 : i32
    %c0_i32_1 = arith.constant 0 : i32
    %c0_i32_2 = arith.constant 0 : i32
    %c0_i32_3 = arith.constant 0 : i32
    return %c0_i32, %c0_i32_0, %c0_i32_1, %c0_i32_2 : i32, i32, i32, i32
  }
  func.func @transform_7(%arg0: i32) -> (i32, i32, i32) {
    %c0_i32 = arith.constant 0 : i32
    %c0_i32_0 = arith.constant 0 : i32
    %c0_i32_1 = arith.constant 0 : i32
    %c0_i32_2 = arith.constant 0 : i32
    return %c0_i32, %c0_i32_0, %c0_i32_1 : i32, i32, i32
  }
  func.func @transform_8(%arg0: i32) -> (i32, i32, i32) {
    %c0_i32 = arith.constant 0 : i32
    %c0_i32_0 = arith.constant 0 : i32
    %c0_i32_1 = arith.constant 0 : i32
    %c0_i32_2 = arith.constant 0 : i32
    return %c0_i32, %c0_i32_0, %c0_i32_1 : i32, i32, i32
  }
  func.func @transform_9(%arg0: i32) -> (i32, i32, i32) {
    %c0_i32 = arith.constant 0 : i32
    %c0_i32_0 = arith.constant 0 : i32
    %c0_i32_1 = arith.constant 0 : i32
    %c0_i32_2 = arith.constant 0 : i32
    return %c0_i32, %c0_i32_0, %c0_i32_1 : i32, i32, i32
  }
  func.func @transform_10(%arg0: i32) -> (i32, i32, i32) {
    %c0_i32 = arith.constant 0 : i32
    %c0_i32_0 = arith.constant 0 : i32
    %c0_i32_1 = arith.constant 0 : i32
    %c0_i32_2 = arith.constant 0 : i32
    return %c0_i32, %c0_i32_0, %c0_i32_1 : i32, i32, i32
  }
  func.func @transform_11(%arg0: i32) -> (i32, i32) {
    %c0_i32 = arith.constant 0 : i32
    %c0_i32_0 = arith.constant 0 : i32
    %c0_i32_1 = arith.constant 0 : i32
    return %c0_i32, %c0_i32_0 : i32, i32
  }
  func.func @transform_12(%arg0: i32) -> (i32, i32, i32) {
    %c0_i32 = arith.constant 0 : i32
    %c0_i32_0 = arith.constant 0 : i32
    %c0_i32_1 = arith.constant 0 : i32
    %c0_i32_2 = arith.constant 0 : i32
    return %c0_i32, %c0_i32_0, %c0_i32_1 : i32, i32, i32
  }
  func.func @transform_13(%arg0: i32) -> (i32, i32, i32) {
    %c0_i32 = arith.constant 0 : i32
    %c0_i32_0 = arith.constant 0 : i32
    %c0_i32_1 = arith.constant 0 : i32
    return %arg0, %c0_i32, %c0_i32_0 : i32, i32, i32
  }
  func.func @transform_14(%arg0: i32) -> (i32, i32, i32) {
    %c0_i32 = arith.constant 0 : i32
    %c0_i32_0 = arith.constant 0 : i32
    %c0_i32_1 = arith.constant 0 : i32
    return %arg0, %c0_i32, %c0_i32_0 : i32, i32, i32
  }
}

</mosaic_0001>

<bundles_post_ra>
// kernel: tpu_custom_call.1
= control target key start
LH: loop header
LB: loop body
LE: loop exit
PB: predicated region body
PF: predicated region fallthrough
CT: control target
= control target key end

     0   :  { %s5946_s0 = inlined_call_operand.vmem [shape: s32[2,8,1], index: 0, kind: input, shape index: {}]   ;;  %s5947_s1 = inlined_call_operand.hbm [shape: f32[2,1,8], index: 1, kind: input, shape index: {}]   ;;  %s5948_s2 = inlined_call_operand.hbm [shape: bf16[100,128], index: 2, kind: input, shape index: {}]   ;;  %s5949_s3 = inlined_call_operand.hbm [shape: bf16[8,128], index: 3, kind: input, shape index: {}]   ;;  %s5950_s4 = inlined_call_operand.hbm [shape: bf16[2,2,128,384], index: 4, kind: input, shape index: {}]   ;;  %s5951_s5 = inlined_call_operand.vmem [shape: f32[2,2,1,384], index: 5, kind: input, shape index: {}]   ;;  %s5952_s6 = inlined_call_operand.hbm [shape: bf16[2,2,128,128], index: 6, kind: input, shape index: {}]   ;;  %s5953_s7 = inlined_call_operand.hbm [shape: bf16[2,128,256], index: 7, kind: input, shape index: {}]   ;;  %s5954_s8 = inlined_call_operand.vmem [shape: f32[2,1,256], index: 8, kind: input, shape index: {}]   ;;  %s5955_s9 = inlined_call_operand.hbm [shape: bf16[2,256,128], index: 9, kind: input, shape index: {}]   ;;  %s5956_s10 = inlined_call_operand.vmem [shape: f32[2,8,128], index: 10, kind: input, shape index: {}]   ;;  %s5957_s11 = inlined_call_operand.vmem [shape: f32[8,128], index: 11, kind: input, shape index: {}]   ;;  %s5958_s12 = inlined_call_operand.hbm [shape: bf16[2,128,128], index: 12, kind: input, shape index: {}]   ;;  %s5959_s13 = inlined_call_operand.vmem [shape: f32[2,1,128], index: 13, kind: input, shape index: {}]   ;;  %s5960_s14 = inlined_call_operand.hbm [shape: f32[2,1,128], index: 14, kind: output, shape index: {}]  }
   0x1   :  { %5973 = sst [smem:[#allocation23_spill]] %s5946_s0 }
   0x2   :  { %5974 = sst [smem:[#allocation24_spill]] %s5948_s2 }
   0x3   :  { %5975 = sst [smem:[#allocation25_spill]] %s5950_s4 }
   0x4   :  { %5976 = sst [smem:[#allocation26_spill]] %s5951_s5 }
   0x5   :  { %5977 = sst [smem:[#allocation27_spill]] %s5954_s8 }
   0x6   :  { %5978 = sst [smem:[#allocation28_spill]] %s5956_s10 }
   0x7   :  { %5979 = sst [smem:[#allocation29_spill]] %s5957_s11 }
   0x8   :  { %5980 = sst [smem:[#allocation30_spill]] %s5959_s13 }
   0x9   :  { %5981 = sst [smem:[#allocation31_spill]] %s5960_s14 }
   0xa   :  { %19 = vsyncpa [#allocation3], 0 }
   0xb   :  { %21 = vsyncpa [#allocation3 + $0x1], 0 }
   0xc   :  { %22 = vsyncpa [#allocation6], 0 }
   0xd   :  { %23 = vsyncpa [#allocation9], 0 }
   0xe   :  { %24 = vsyncpa [#allocation12], 0 }
   0xf   :  { %25 = vsyncpa [#allocation15], 0 }
  0x10   :  { %26 = vsyncpa [#allocation4], 0 }
  0x11   :  { %28 = vsyncpa [#allocation4 + $0x1], 0  ;;  %s5298_s29 = smov 0   ;;  %s5300_s30 = smov 0  }
  0x12   :  { %s5302_s15 = smov 0   ;;  %s5304_s16 = smov 0  }
  0x13 LB: > { %s5205_s17 = smov [#allocation5]   ;;  %s5319_s19 = sadd.s32 4294967295, %s5203_s16   ;;  %s5203_s16 = sphi %s5304_s16, %s6016_s16   ;;  %s5199_s15 = sphi %s5302_s15, %s6015_s15   ;;  %s5195_s30 = sphi %s5300_s30, %s6014_s30   ;;  %s5191_s29 = sphi %s5298_s29, %s6013_s29  }
  0x14   : > { %s386_s18 = sshll.u32 %s5205_s17, 4  ;;  %p3796_p0 = scmp.ge.s32.totalorder %s5203_s16, 1  ;;  %s5324_s18 = int_to_ptr.vmem [resolvable:$true] %s386_s18 }
  0x15   : > { %p5968_p1 = scmp.eq.s32.totalorder %s5319_s19, 0  ;;  %p374_p2 = scmp.lt.s32.totalorder %s5203_s16, 3 }
  0x16   : > { %s5206_s21 = smov [#allocation8]   ;;  %s5207_s24 = smov [#allocation11]  }
  0x17   : > { %p5326_p3 = pnand %p3796_p0, %p374_p2  ;;  %s410_s22 = sshll.u32 %s5206_s21, 4  ;;  %s5339_s22 = int_to_ptr.vmem [resolvable:$true] %s410_s22 }
  0x18   : > { %s5341_s25 = sshll.u32 %s5207_s24, 4  ;;  %s5984_s2 = sld [smem:[#allocation24_spill]]  ;;  %s440_s25 = int_to_ptr.vmem [resolvable:$true] %s5341_s25 }
  0x19   : > { %s5982_s20 = scalar_select %p5326_p3, 1, 0 }
  0x1a   : > { %p4501_p5 = pneg %p5326_p3 }
  0x1c   : > { %p5335_p6 = pnand %p4501_p5, %p5968_p1 }
  0x1e   : > { %s4895_s28 = scalar_lea.hbm %s5984_s2, 832  ;;  %p5351_p8 = pneg %p5335_p6 }
  0x1f   : > { %p4896_p7 = scmp.ne.s32.totalorder %s5984_s2, %s4895_s28  ;;  %p4902_p11 = scmp.lt.u32.totalorder %s4895_s28, %s5984_s2 }
  0x21   : > { %p4898_p9 = pnand %p5351_p8, %p4896_p7 }
  0x23   : > { %p4899_p10 = pneg %p4898_p9 }
  0x25   : > { %p4904_p12 = pnand %p4902_p11, %p4899_p10 }
  0x27   : > { %4907 = shalt.err (!%p4904_p12)
}
  0x28   : > { %s4908_s14 = scalar_lea.vmem %s5324_s18, 832  ;;  %p4916_p5 = scmp.lt.s32.totalorder %s5324_s18, %s5324_s18 }
  0x29   : > { %p4909_p13 = scmp.ne.s32.totalorder %s5324_s18, %s4908_s14  ;;  %p4917_p4 = scmp.lt.s32.totalorder %s4908_s14, %s4908_s14 }
  0x2b   : > { %p4911_p0 = pnand %p4909_p13, %p5351_p8  ;;  %p4918_p7 = por %p4917_p4, %p4916_p5 }
  0x2d   : > { %p4912_p2 = pneg %p4911_p0 }
  0x2f   : > { %p4919_p9 = pnand %p4918_p7, %p4912_p2 }
  0x31   : > { %4922 = shalt.err (!%p4919_p9)
}
  0x32   : > { %s5966_s26 = smov 64   ;;  %s5970_s13 = smov 4  }
  0x33   : > { %4504 = dma.hbm_to_vmem [thread:$0]  (!%p5335_p6), %s5984_s2, 832, %s5324_s18, [#allocation6], %s5966_s26, %s5966_s26, %s5970_s13  }
  0x34   : > { %s5986_s4 = sld [smem:[#allocation25_spill]] }
  0x3a   : > { %s4923_s14 = scalar_lea.hbm %s5986_s4, 12288 }
  0x3b   : > { %p4924_p4 = scmp.ne.s32.totalorder %s5986_s4, %s4923_s14  ;;  %p4930_p12 = scmp.lt.u32.totalorder %s4923_s14, %s5986_s4 }
  0x3d   : > { %p4926_p10 = pnand %p4924_p4, %p5351_p8 }
  0x3f   : > { %p4927_p11 = pneg %p4926_p10 }
  0x41   : > { %p4932_p13 = pnand %p4930_p12, %p4927_p11 }
  0x43   : > { %4935 = shalt.err (!%p4932_p13)
}
  0x44   : > { %s4936_s18 = scalar_lea.vmem %s5339_s22, 12288  ;;  %p4944_p7 = scmp.lt.s32.totalorder %s5339_s22, %s5339_s22 }
  0x45   : > { %p4937_p0 = scmp.ne.s32.totalorder %s5339_s22, %s4936_s18  ;;  %p4945_p9 = scmp.lt.s32.totalorder %s4936_s18, %s4936_s18 }
  0x47   : > { %p4939_p2 = pnand %p4937_p0, %p5351_p8  ;;  %p4946_p4 = por %p4945_p9, %p4944_p7 }
  0x49   : > { %p4940_p5 = pneg %p4939_p2 }
  0x4b   : > { %p4947_p10 = pnand %p4946_p4, %p4940_p5 }
  0x4d   : > { %4950 = shalt.err (!%p4947_p10)
}
  0x4e   : > { %s5210_s8 = smov 192   ;;  %s5211_s5 = smov 12  }
  0x4f   : > { %4510 = dma.hbm_to_vmem [thread:$0]  (!%p5335_p6), %s5986_s4, 12288, %s5339_s22, [#allocation9], %s5210_s8, %s5210_s8, %s5211_s5  }
  0x50   : > { %s4951_s17 = scalar_lea.hbm %s5953_s7, 4096 }
  0x51   : > { %p4952_p11 = scmp.ne.s32.totalorder %s5953_s7, %s4951_s17  ;;  %p4958_p0 = scmp.lt.u32.totalorder %s4951_s17, %s5953_s7 }
  0x53   : > { %p4954_p12 = pnand %p4952_p11, %p5351_p8 }
  0x55   : > { %p4955_p13 = pneg %p4954_p12 }
  0x57   : > { %p4960_p2 = pnand %p4958_p0, %p4955_p13 }
  0x59   : > { %4963 = shalt.err (!%p4960_p2)
}
  0x5a   : > { %s4964_s10 = scalar_lea.vmem %s440_s25, 4096  ;;  %p4972_p4 = scmp.lt.s32.totalorder %s440_s25, %s440_s25 }
  0x5b   : > { %p4965_p5 = scmp.ne.s32.totalorder %s440_s25, %s4964_s10  ;;  %p4973_p10 = scmp.lt.s32.totalorder %s4964_s10, %s4964_s10 }
  0x5d   : > { %p4967_p7 = pnand %p4965_p5, %p5351_p8  ;;  %p4974_p1 = por %p4973_p10, %p4972_p4 }
  0x5f   : > { %p4968_p9 = pneg %p4967_p7 }
  0x61   : > { %p4975_p3 = pnand %p4974_p1, %p4968_p9 }
  0x63   : > { %4978 = shalt.err (!%p4975_p3)
}
  0x64   : > { %s5212_s22 = smov 128   ;;  %s5213_s8 = smov 8  }
  0x65   : > { %4516 = dma.hbm_to_vmem [thread:$0]  (!%p5335_p6), %s5953_s7, 4096, %s440_s25, [#allocation12], %s5212_s22, %s5212_s22, %s5213_s8  }
  0x66   : > { %s5214_s11 = smov [#allocation7]   ;;  %s5215_s28 = smov [#allocation10]  }
  0x67   : > { %s400_s27 = sshll.u32 %s5214_s11, 4  ;;  %s426_s17 = sshll.u32 %s5215_s28, 4  ;;  %s401_s27 = int_to_ptr.vmem [resolvable:$true] %s400_s27  ;;  %s427_s17 = int_to_ptr.vmem [resolvable:$true] %s426_s17 }
  0x68   : > { %s4979_s18 = scalar_lea.hbm %s5949_s3, 64 }
  0x69   : > { %p4980_p1 = scmp.ne.s32.totalorder %s5949_s3, %s4979_s18  ;;  %p4986_p12 = scmp.lt.u32.totalorder %s4979_s18, %s5949_s3 }
  0x6b   : > { %p4982_p3 = pnand %p4980_p1, %p5351_p8 }
  0x6d   : > { %p4983_p11 = pneg %p4982_p3 }
  0x6f   : > { %p4988_p13 = pnand %p4986_p12, %p4983_p11 }
  0x71   : > { %4991 = shalt.err (!%p4988_p13)
}
  0x72   : > { %s4992_s25 = scalar_lea.vmem %s401_s27, 64  ;;  %p5000_p7 = scmp.lt.s32.totalorder %s401_s27, %s401_s27 }
  0x73   : > { %p4993_p0 = scmp.ne.s32.totalorder %s401_s27, %s4992_s25  ;;  %p5001_p9 = scmp.lt.s32.totalorder %s4992_s25, %s4992_s25 }
  0x75   : > { %p4995_p2 = pnand %p4993_p0, %p5351_p8  ;;  %p5002_p4 = por %p5001_p9, %p5000_p7 }
  0x77   : > { %p4996_p5 = pneg %p4995_p2 }
  0x79   : > { %p5003_p10 = pnand %p5002_p4, %p4996_p5 }
  0x7b   : > { %5006 = shalt.err (!%p5003_p10)
}
  0x7c   : > { %4507 = dma.hbm_to_vmem [thread:$0]  (!%p5335_p6), %s5949_s3, 64, %s401_s27, [#allocation6]  }
  0x7d   : > { %s5007_s8 = scalar_lea.hbm %s5952_s6, 4096 }
  0x7e   : > { %p5008_p1 = scmp.ne.s32.totalorder %s5952_s6, %s5007_s8  ;;  %p5014_p12 = scmp.lt.u32.totalorder %s5007_s8, %s5952_s6 }
  0x80   : > { %p5010_p3 = pnand %p5008_p1, %p5351_p8 }
  0x82   : > { %p5011_p11 = pneg %p5010_p3 }
  0x84   : > { %p5016_p13 = pnand %p5014_p12, %p5011_p11 }
  0x86   : > { %5019 = shalt.err (!%p5016_p13)
}
  0x87   : > { %s5020_s24 = scalar_lea.vmem %s427_s17, 4096  ;;  %p5028_p7 = scmp.lt.s32.totalorder %s427_s17, %s427_s17 }
  0x88   : > { %p5021_p0 = scmp.ne.s32.totalorder %s427_s17, %s5020_s24  ;;  %p5029_p9 = scmp.lt.s32.totalorder %s5020_s24, %s5020_s24 }
  0x8a   : > { %p5023_p2 = pnand %p5021_p0, %p5351_p8  ;;  %p5030_p4 = por %p5029_p9, %p5028_p7 }
  0x8c   : > { %p5024_p5 = pneg %p5023_p2 }
  0x8e   : > { %p5031_p10 = pnand %p5030_p4, %p5024_p5 }
  0x90   : > { %5034 = shalt.err (!%p5031_p10)
}
  0x91   : > { %s5987_s27 = smov 4   ;;  %s5988_s14 = smov 64  }
  0x92   : > { %4513 = dma.hbm_to_vmem [thread:$0]  (!%p5335_p6), %s5952_s6, 4096, %s427_s17, [#allocation9], %s5988_s14, %s5988_s14, %s5987_s27  }
  0x93   : > { %s5216_s25 = smov [#allocation13]   ;;  %s5217_s22 = smov [#allocation14]  }
  0x94   : > { %s455_s13 = sshll.u32 %s5216_s25, 4  ;;  %s474_s2 = sshll.u32 %s5217_s22, 4  ;;  %s456_s13 = int_to_ptr.vmem [resolvable:$true] %s455_s13  ;;  %s475_s2 = int_to_ptr.vmem [resolvable:$true] %s474_s2 }
  0x95   : > { %s5035_s26 = scalar_lea.hbm %s5955_s9, 4096 }
  0x96   : > { %p5036_p1 = scmp.ne.s32.totalorder %s5955_s9, %s5035_s26  ;;  %p5042_p12 = scmp.lt.u32.totalorder %s5035_s26, %s5955_s9 }
  0x98   : > { %p5038_p3 = pnand %p5036_p1, %p5351_p8 }
  0x9a   : > { %p5039_p11 = pneg %p5038_p3 }
  0x9c   : > { %p5044_p13 = pnand %p5042_p12, %p5039_p11 }
  0x9e   : > { %5047 = shalt.err (!%p5044_p13)
}
  0x9f   : > { %s5048_s17 = scalar_lea.vmem %s456_s13, 4096  ;;  %p5056_p7 = scmp.lt.s32.totalorder %s456_s13, %s456_s13 }
  0xa0   : > { %p5049_p0 = scmp.ne.s32.totalorder %s456_s13, %s5048_s17  ;;  %p5057_p9 = scmp.lt.s32.totalorder %s5048_s17, %s5048_s17 }
  0xa2   : > { %p5051_p2 = pnand %p5049_p0, %p5351_p8  ;;  %p5058_p4 = por %p5057_p9, %p5056_p7 }
  0xa4   : > { %p5052_p5 = pneg %p5051_p2 }
  0xa6   : > { %p5059_p10 = pnand %p5058_p4, %p5052_p5 }
  0xa8   : > { %5062 = shalt.err (!%p5059_p10)
}
  0xa9   : > { %4519 = dma.hbm_to_vmem [thread:$0]  (!%p5335_p6), %s5955_s9, 4096, %s456_s13, [#allocation12], %s5988_s14, %s5988_s14, %s5987_s27  }
  0xaa   : > { %s5063_s4 = scalar_lea.hbm %s5958_s12, 2048 }
  0xab   : > { %p5064_p1 = scmp.ne.s32.totalorder %s5958_s12, %s5063_s4  ;;  %p5070_p12 = scmp.lt.u32.totalorder %s5063_s4, %s5958_s12 }
  0xad   : > { %p5066_p3 = pnand %p5064_p1, %p5351_p8 }
  0xaf   : > { %p5067_p11 = pneg %p5066_p3 }
  0xb1   : > { %p5072_p13 = pnand %p5070_p12, %p5067_p11 }
  0xb3   : > { %5075 = shalt.err (!%p5072_p13)
}
  0xb4   : > { %s5076_s28 = scalar_lea.vmem %s475_s2, 2048  ;;  %p5084_p7 = scmp.lt.s32.totalorder %s475_s2, %s475_s2 }
  0xb5   : > { %p5077_p0 = scmp.ne.s32.totalorder %s475_s2, %s5076_s28  ;;  %p5085_p9 = scmp.lt.s32.totalorder %s5076_s28, %s5076_s28 }
  0xb7   : > { %p5079_p2 = pnand %p5077_p0, %p5351_p8  ;;  %p5086_p4 = por %p5085_p9, %p5084_p7 }
  0xb9   : > { %p5080_p5 = pneg %p5079_p2 }
  0xbb   : > { %p5087_p10 = pnand %p5086_p4, %p5080_p5 }
  0xbd   : > { %5090 = shalt.err (!%p5087_p10)
}
  0xbe   : > { %4522 = dma.hbm_to_vmem [thread:$0]  (!%p5335_p6), %s5958_s12, 2048, %s475_s2, [#allocation15], %s5988_s14, %s5988_s14, %s5987_s27  }
  0xbf   : > { %s3795_s23 = sadd.s32 4294967294, %s5203_s16   ;;  %s5500_s21 = sadd.s32 1, %s5203_s16  }
  0xc0   : > { %s67_s17 = sadd.s32 1, %s5199_s15  ;;  %s64_s18 = ssub.s32 %s5203_s16, %s5500_s21 }
  0xc1   : > { %p74_p8 = scmp.ne.s32.totalorder %s5199_s15, %s5195_s30  ;;  %p65_p1 = scmp.eq.s32.totalorder %s64_s18, 0 }
  0xc2   : > { %p75_p3 = scmp.eq.s32.totalorder %s5203_s16, 0  ;;  %p80_p11 = scmp.ne.s32.totalorder %s5195_s30, %s5191_s29 }
  0xc3   : > { %p361_p12 = scmp.eq.s32.totalorder %s5319_s19, 1  ;;  %p5989_p0 = scmp.eq.s32.totalorder %s5319_s19, 0 }
  0xc4   : > { %s5512_s10 = scalar_select %p65_p1, %s5199_s15, %s67_s17  }
  0xc5   : > { %p76_p13 = por %p75_p3, %p74_p8  ;;  %p5516_p2 = por %p5989_p0, %p80_p11 }
  0xc6   : > { %p5520_p6 = por %p361_p12, %p74_p8  ;;  %p367_p5 = scmp.eq.s32.totalorder %s3795_s23, 1 }
  0xc7   : > { %p4538_p7 = scmp.lt.s32.totalorder %s5203_s16, 2  ;;  %s495_s14 = sand.u32 1, %s5199_s15  }
  0xc8   : > { %s5991_s27 = scalar_select %p5520_p6, 1, 0 }
  0xc9   : > { %p5526_p9 = por %p367_p5, %p80_p11  ;;  %s3805_s22 = sshll.u32 %s5203_s16, 4 }
  0xca   : > { %s5534_s26 = scalar_lea.hbm %s5947_s1, %s3805_s22  ;;  %s498_s5 = scalar_lea.vmem [#allocation2], %s495_s14 }
  0xcb   : > { %s5992_s2 = scalar_select %p5526_p9, 1, 0 }
  0xcc   : > { %s505_s11 = sshll.u32 %s498_s5, 4  ;;  %p5538_p4 = pnand %p4538_p7, %p76_p13  ;;  %s5536_s11 = int_to_ptr.vmem [resolvable:$true] %s505_s11 }
  0xcd   : > { %s496_s13 = scalar_lea.sflag [#allocation3], %s495_s14  ;;  %s5091_s24 = scalar_lea.hbm %s5534_s26, 16 }
  0xce   : > { %p5092_p10 = scmp.ne.s32.totalorder %s5534_s26, %s5091_s24  ;;  %p5093_p8 = pneg %p5538_p4 }
  0xcf   : > { %s5096_s18 = scalar_lea.hbm %s5947_s1, 32  ;;  %p5097_p11 = scmp.lt.u32.totalorder %s5534_s26, %s5947_s1 }
  0xd0   : > { %p5094_p1 = pnand %p5093_p8, %p5092_p10  ;;  %p5098_p12 = scmp.lt.u32.totalorder %s5096_s18, %s5091_s24 }
  0xd1   : > { %p5100_p0 = scmp.lt.u32.totalorder %s5091_s24, %s5534_s26 }
  0xd2   : > { %p5095_p3 = pneg %p5094_p1  ;;  %p5099_p13 = por %p5098_p12, %p5097_p11 }
  0xd4   : > { %p5101_p5 = por %p5100_p0, %p5099_p13 }
  0xd6   : > { %p5102_p7 = pnand %p5101_p5, %p5095_p3 }
  0xd8   : > { %5105 = shalt.err (!%p5102_p7)
}
  0xd9   : > { %s5106_s14 = scalar_lea.vmem %s5536_s11, 16  ;;  %s5218_s8 = smov [#allocation2]  }
  0xda   : > { %p5107_p10 = scmp.ne.s32.totalorder %s5536_s11, %s5106_s14  ;;  %s5111_s5 = sshll.u32 %s5218_s8, 4  ;;  %s5112_s5 = int_to_ptr.vmem [resolvable:$false] %s5111_s5 }
  0xdb   : > { %s5113_s23 = scalar_lea.vmem %s5112_s5, 32  ;;  %p5114_p6 = scmp.lt.s32.totalorder %s5536_s11, %s5112_s5 }
  0xdc   : > { %p5109_p1 = pnand %p5107_p10, %p5093_p8  ;;  %p5115_p11 = scmp.lt.s32.totalorder %s5113_s23, %s5106_s14 }
  0xde   : > { %p5110_p9 = pneg %p5109_p1  ;;  %p5116_p12 = por %p5115_p11, %p5114_p6 }
  0xe0   : > { %p5117_p13 = pnand %p5116_p12, %p5110_p9 }
  0xe2   : > { %5120 = shalt.err (!%p5117_p13)
}
  0xe3   : > { %4526 = dma.hbm_to_vmem [thread:$0]  (!%p5538_p4), %s5534_s26, 16, %s5536_s11, %s496_s13  }
  0xe4   : > { %p5994_p3 = scmp.ne.s32.totalorder %s5982_s20, 0 }
  0xe5   : > { %s5570_s24 = sand.u32 (!%p5994_p3), 1, %s5195_s30  }
  0xe6   : > { %520 = sbr.rel (%p5994_p3) target bundleno = 5990 (0x1766), region = 76  ;;  %s523_s17 = scalar_lea.sflag (!%p5994_p3), [#allocation3], %s5570_s24 }
  0xe7   : > { %s525_s18 = scalar_lea.vmem (!%p5994_p3), [#allocation2], %s5570_s24 }
  0xed   : > { %5166 = dma.done.wait (%p5516_p2), %s523_s17, 16  }
  0xee   : > { %5168 = vsyncadd (%p5516_p2), %s523_s17, 4294967280  ;;  %p5995_p6 = scmp.eq.s32.totalorder %s5319_s19, 0 }
  0xf0   : > { %5170 = dma.done.wait (%p5995_p6), [#allocation6], 896   ;;  %p5996_p9 = pmov %p5995_p6 }
  0xf1   : > { %p5997_p4 = pmov %p5995_p6 }
  0xf2   : > { %5172 = vsyncadd (%p5996_p9), [#allocation6], 4294966400 }
  0xf3   : > { %5174 = dma.done.wait (%p5997_p4), [#allocation9], 16384   ;;  %p5998_p8 = pmov %p5997_p4 }
  0xf4   : > { %p5999_p0 = pmov %p5997_p4 }
  0xf5   : > { %5176 = vsyncadd (%p5998_p8), [#allocation9], 4294950912 }
  0xf6   : > { %5178 = dma.done.wait (%p5999_p0), [#allocation12], 8192   ;;  %p6000_p5 = pmov %p5999_p0 }
  0xf7   : > { %p6001_p2 = pmov %p5999_p0 }
  0xf8   : > { %5180 = vsyncadd (%p6000_p5), [#allocation12], 4294959104 }
  0xf9   : > { %5182 = dma.done.wait (%p6001_p2), [#allocation15], 2048   ;;  %p6002_p7 = pmov %p5999_p0 }
  0xfa   : > { %p603_p10 = scmp.lt.s32.totalorder %s5319_s19, 1  ;;  %v5219_v0 = vmov 0   ;;  %v5220_v1 = vmov 0.0   ;;  %s6003_s0 = sld [smem:[#allocation23_spill]]  ;;  %v4596_v3 = vld [vmem:[#allocation5] sm:$0xff]   ;;  %v4597_v4 = vld [vmem:[#allocation5 + $0x8] sm:$0xff]   ;;  %v612_v11 = vlaneseq }
  0xfb   : > { %5184 = vsyncadd (%p6002_p7), [#allocation15], 4294965248  ;;  %4595 = vset.pattern.permute.xlu0 %v5219_v0  ;;  %4203 = vmatprep.subr.bf16.mxu0 %v5220_v1  ;;  %vm5221_vm0 = vmmov 0   ;;  %v4598_v5 = vld [vmem:[#allocation5 + $0x10] sm:$0xff]   ;;  %v4599_v6 = vld [vmem:[#allocation5 + $0x18] sm:$0xff]   ;;  %vm678_vm1 = vcmask 1041408  }
  0xfc   : > { %s5598_s20 = scalar_select %p603_p10, %s5319_s19, 1  ;;  %1007 = vmatprep.mubr.bf16.mxu1 %v5219_v0  ;;  %4204 = vmatpush3.bf16.msra.mxu0 %v4596_v3  ;;  %v4600_v7 = vld [vmem:[#allocation5 + $0x20] sm:$0xff]   ;;  %v4601_v8 = vld [vmem:[#allocation5 + $0x28] sm:$0xff]   ;;  %v4602_v9 = vld [vmem:[#allocation5 + $0x30] ss:$0 sps:$4 sm:$0x33]  }
  0xfd   : > { %4205 = vmatprep.subr.bf16.mxu0 %v5220_v1  ;;  %4217 = vmatprep.mubr.msk.bf16.mxu0 %vm5221_vm0, %v5220_v1  ;;  %v680_v10 = vsel %vm678_vm1, %v4602_v9, 0  ;;  %v613_v12 = vand.u32 127, %v612_v11  ;;  %vm674_vm3 = vcmask 818176   ;;  %v633_v16 = vld [vmem:[#allocation7] sm:$0xf]  ;;  %s6004_s4 = sld [smem:[#allocation29_spill]] }
  0xfe   : > { %s3814_s25 = sshll.u32 %s5598_s20, 3  ;;  %v634_v17 = vunpack.c.l.bf16 %v633_v16  ;;  %v4603_v23 = vld [vmem:[#allocation8 + $0x4] ss:$12 sps:$4 sm:$0xff]   ;;  %v4605_v24 = vld [vmem:[#allocation8] ss:$12 sps:$4 sm:$0xff]   ;;  %s6005_s17 = sld [smem:[#allocation26_spill]] }
  0xff   : > { %v4606_v25 = vld [vmem:[#allocation8 + $0x8] ss:$12 sps:$4 sm:$0xff]   ;;  %975 = vmatprep.subr.bf16.mxu1 %v4603_v23  ;;  %v4610_v27 = vld [vmem:[#allocation8 + $0x20] ss:$12 sps:$4 sm:$0xff]   ;;  %v4609_v28 = vld [vmem:[#allocation8 + $0x18] ss:$12 sps:$4 sm:$0xff]  }
 0x100   : > { %s606_s28 = scalar_lea.vmem %s6003_s0, %s3814_s25  ;;  %4206 = vmatpush3.bf16.msra.mxu0 %v4597_v4  ;;  %v4607_v26 = vld [vmem:[#allocation8 + $0x1c] ss:$12 sps:$4 sm:$0xff]   ;;  %976 = vmatpush1.bf16.msra.mxu1 %v4605_v24  ;;  %v4611_v29 = vld [vmem:[#allocation8 + $0x34] ss:$12 sps:$4 sm:$0xff]   ;;  %v4614_v30 = vld [vmem:[#allocation8 + $0x38] ss:$12 sps:$4 sm:$0xff]  }
 0x101   : > { %v611_v2 = vld [vmem:[%s606_s28] sm:$0xff]  ;;  %4207 = vmatprep.subr.bf16.mxu0 %v5220_v1  ;;  %977 = vmatprep.subr.bf16.mxu1 %v4607_v26  ;;  %v4619_v39 = vld [vmem:[#allocation8 + $0x64] ss:$12 sps:$4 sm:$0xff]   ;;  %v4621_v40 = vld [vmem:[#allocation8 + $0x60] ss:$12 sps:$4 sm:$0xff]   ;;  %v5653_v24 = vshrl.u32 %v612_v11, 7 }
 0x102   : > { %615 = vperm.xlu0 %4595, %v611_v2   ;;  %v4613_v31 = vld [vmem:[#allocation8 + $0x30] ss:$12 sps:$4 sm:$0xff]   ;;  %v4615_v36 = vld [vmem:[#allocation8 + $0x4c] ss:$12 sps:$4 sm:$0xff]   ;;  %v4617_v37 = vld [vmem:[#allocation8 + $0x48] ss:$12 sps:$4 sm:$0xff]  }
 0x103   : > { %v4618_v38 = vld [vmem:[#allocation8 + $0x50] ss:$12 sps:$4 sm:$0xff]   ;;  %v4622_v41 = vld [vmem:[#allocation8 + $0x68] ss:$12 sps:$4 sm:$0xff]   ;;  %v4625_v43 = vld [vmem:[#allocation8 + $0x78] ss:$12 sps:$4 sm:$0xff]  }
 0x104   : > { %4208 = vmatpush3.bf16.msra.mxu0 %v4598_v5  ;;  %978 = vmatpush1.bf16.msra.mxu1 %v4609_v28  ;;  %v4623_v42 = vld [vmem:[#allocation8 + $0x7c] ss:$12 sps:$4 sm:$0xff]   ;;  %v4626_v44 = vld [vmem:[#allocation8 + $0x80] ss:$12 sps:$4 sm:$0xff]   ;;  %v4630_v47 = vld [vmem:[#allocation8 + $0x98] ss:$12 sps:$4 sm:$0xff]  }
 0x105   : > { %4209 = vmatprep.subr.bf16.mxu0 %v5220_v1  ;;  %979 = vmatprep.subr.bf16.mxu1 %v4611_v29  ;;  %v4627_v45 = vld [vmem:[#allocation8 + $0x94] ss:$12 sps:$4 sm:$0xff]   ;;  %v4629_v46 = vld [vmem:[#allocation8 + $0x90] ss:$12 sps:$4 sm:$0xff]   ;;  %v4631_v48 = vld [vmem:[#allocation8 + $0xac] ss:$12 sps:$4 sm:$0xff]  }
 0x106   : > { %v4633_v49 = vld [vmem:[#allocation8 + $0xa8] ss:$12 sps:$4 sm:$0xff]   ;;  %v4634_v50 = vld [vmem:[#allocation8 + $0xb0] ss:$12 sps:$4 sm:$0xff]   ;;  %v4635_v61 = vld [vmem:[#allocation8 + $0xc0] ss:$12 sps:$4 sm:$0xff]  }
 0x107   : > { %v4637_v51 = vld [vmem:[#allocation8 + $0xc4] ss:$12 sps:$4 sm:$0xff]   ;;  %v3823_v56 = vld [vmem:[%s6004_s4] ss:$0 sm:$0xff]  ;;  %v3824_v58 = vld [vmem:[%s6004_s4 + $0x1] ss:$0 sm:$0xff] }
 0x108   : > { %4210 = vmatpush3.bf16.msra.mxu0 %v4599_v6  ;;  %980 = vmatpush1.bf16.msra.mxu1 %v4613_v31  ;;  %v4638_v62 = vld [vmem:[#allocation8 + $0xc8] ss:$12 sps:$4 sm:$0xff]   ;;  %v4639_v3 = vld [vmem:[#allocation8 + $0xd8] ss:$12 sps:$4 sm:$0xff]   ;;  %v4642_v4 = vld [vmem:[#allocation8 + $0xe0] ss:$12 sps:$4 sm:$0xff]  }
 0x109   : > { %4211 = vmatprep.subr.bf16.mxu0 %v5220_v1  ;;  %981 = vmatprep.subr.bf16.mxu1 %v4615_v36  ;;  %v4641_v2 = vld [vmem:[#allocation8 + $0xdc] ss:$12 sps:$4 sm:$0xff]   ;;  %v4645_v5 = vld [vmem:[#allocation8 + $0xf4] ss:$12 sps:$4 sm:$0xff]   ;;  %v4655_v16 = vld [vmem:[#allocation8 + $0x138] ss:$12 sps:$4 sm:$0xff]  }
 0x10a   : > { %v4643_v6 = vld [vmem:[#allocation8 + $0xf0] ss:$12 sps:$4 sm:$0xff]   ;;  %v4647_v9 = vld [vmem:[#allocation8 + $0x108] ss:$12 sps:$4 sm:$0xff]   ;;  %v5663_v28 = vsub.s32 0, %v5653_v24  ;;  %vm1389_vm4 = vcmask 1043456  }
 0x10b   : > { %v4666_v23 = vld [vmem:[#allocation8 + $0x170] ss:$12 sps:$4 sm:$0xff]   ;;  %v813_v26 = vld [vmem:[%s6005_s17] sm:$0x7]  ;;  %vm1359_vm5 = vcmask 64512   ;;  %s6006_s28 = sld [smem:[#allocation28_spill]] }
 0x10c   : > { %4212 = vmatpush3.bf16.msra.mxu0 %v4600_v7  ;;  %982 = vmatpush1.bf16.msra.mxu1 %v4617_v37  ;;  %v4646_v7 = vld [vmem:[#allocation8 + $0xf8] ss:$12 sps:$4 sm:$0xff]   ;;  %s6007_s14 = sld [smem:[#allocation27_spill]]  ;;  %s6008_s25 = sld [smem:[#allocation30_spill]] }
 0x10d   : > { %4213 = vmatprep.subr.bf16.mxu0 %v5220_v1  ;;  %983 = vmatprep.subr.bf16.mxu1 %v4619_v39  ;;  %s4042_s13 = sshll.u32 %s5319_s19, 4  ;;  %s602_s22 = scalar_lea.vmem [#allocation16], %s5570_s24 }
 0x10e   : > { %s3644_s8 = sshll.u32 %s602_s22, 4  ;;  %p6010_p11 = scmp.ne.s32.totalorder %s5991_s27, 0  ;;  %s5904_s8 = int_to_ptr.vmem [resolvable:$true] %s3644_s8 }
 0x10f   : > { %s5121_s19 = scalar_lea.vmem %s5904_s8, 16 }
 0x110   : > { %4214 = vmatpush3.bf16.msra.mxu0 %v4601_v8  ;;  %984 = vmatpush1.bf16.msra.mxu1 %v4621_v40  ;;  %v4649_v8 = vld [vmem:[#allocation8 + $0x10c] ss:$12 sps:$4 sm:$0xff]   ;;  %p5122_p1 = scmp.ne.s32.totalorder %s5904_s8, %s5121_s19 }
 0x111   : > { %4215 = vmatprep.subr.bf16.mxu0 %v5220_v1  ;;  %985 = vmatprep.subr.bf16.mxu1 %v4623_v42  ;;  %v5673_v42 = vsub.s32 2, %v5653_v24 }
 0x112   : > { %s609_s26 = scalar_lea.vmem %s6008_s25, %s5598_s20  ;;  %s6009_s20 = sld [smem:[#allocation31_spill]] }
 0x113   : > { %s3632_s25 = scalar_lea.sflag [#allocation4], %s5570_s24  ;;  %p5123_p12 = pnand %p5122_p1, %p6010_p11 }
 0x114   : > { %4216 = vmatpush3.bf16.msra.mxu0 %v680_v10  ;;  %986 = vmatpush1.bf16.msra.mxu1 %v4625_v43  ;;  %v4650_v10 = vld [vmem:[#allocation8 + $0x110] ss:$12 sps:$4 sm:$0xff]  }
 0x115   : > { %4221 = vmatprep.subr.bf16.mxu0 %v5220_v1  ;;  %987 = vmatprep.subr.bf16.mxu1 %v4627_v45  ;;  %p5124_p13 = pneg %p5123_p12 }
 0x118   : > { %988 = vmatpush1.bf16.msra.mxu1 %v4629_v46  ;;  %s5902_s23 = scalar_lea.hbm %s6009_s20, %s4042_s13 }
 0x119   : > { %989 = vmatprep.subr.bf16.mxu1 %v4631_v48 }
 0x11c   : > { %990 = vmatpush1.bf16.msra.mxu1 %v4633_v49 }
 0x11d   : > { %1184 = vmatprep.subr.bf16.mxu1 %v4637_v51 }
 0x181   : > { %v616_v13 = vpop.permute.xlu0 %615 }
 0x182   : > { %vm617_vm2 = vcmp.eq.s32.totalorder %v613_v12, %v616_v13  ;;  %v4653_v12 = vld [vmem:[#allocation8 + $0x124] ss:$12 sps:$4 sm:$0xff]   ;;  %v4651_v13 = vld [vmem:[#allocation8 + $0x120] ss:$12 sps:$4 sm:$0xff]  }
 0x183   : > { %v618_v14 = vsel %vm617_vm2, 1.0, %v5220_v1 }
 0x184   : > { %v619_v15 = vpack.c.bf16 %v618_v14, %v618_v14  ;;  %v4654_v14 = vld [vmem:[#allocation8 + $0x128] ss:$12 sps:$4 sm:$0xff]  }
 0x186   : > { %4218 = vmatmul.mubr.msk.bf16.vlgmr.msra.gmra.mrb[0].mxu0 %vm674_vm3, %v619_v15  ;;  %v4657_v15 = vld [vmem:[#allocation8 + $0x13c] ss:$12 sps:$4 sm:$0xff]  }
 0x187   : > { %4237 = vmatprep.mubr.msk.bf16.mxu0 %vm5221_vm0, %v5220_v1  ;;  %4222 = vmatpush3.bf16.msra.mxu0 %v4606_v25  ;;  %v5656_v25 = vsub.s32 1, %v5653_v24 }
 0x188   : > { %4223 = vmatprep.subr.bf16.mxu0 %v5220_v1 }
 0x18b   : > { %4224 = vmatpush3.bf16.msra.mxu0 %v4610_v27  ;;  %v824_v27 = vrot.slane %v813_v26, %v5656_v25 }
 0x18c   : > { %4225 = vmatprep.subr.bf16.mxu0 %v5220_v1 }
 0x18f   : > { %4226 = vmatpush3.bf16.msra.mxu0 %v4614_v30 }
 0x190   : > { %4227 = vmatprep.subr.bf16.mxu0 %v5220_v1 }
 0x193   : > { %4228 = vmatpush3.bf16.msra.mxu0 %v4618_v38 }
 0x194   : > { %4229 = vmatprep.subr.bf16.mxu0 %v5220_v1 }
 0x197   : > { %4230 = vmatpush3.bf16.msra.mxu0 %v4622_v41  ;;  %v814_v41 = vld [vmem:[%s6005_s17 + $0x3] sm:$0x7] }
 0x198   : > { %4231 = vmatprep.subr.bf16.mxu0 %v5220_v1  ;;  %v840_v43 = vrot.slane %v814_v41, %v5673_v42 }
 0x19b   : > { %4232 = vmatpush3.bf16.msra.mxu0 %v4626_v44  ;;  %v836_v44 = vrot.slane %v814_v41, %v5656_v25 }
 0x19c   : > { %4233 = vmatprep.subr.bf16.mxu0 %v5220_v1 }
 0x19f   : > { %4234 = vmatpush3.bf16.msra.mxu0 %v4630_v47  ;;  %v828_v47 = vrot.slane %v813_v26, %v5673_v42 }
 0x1a0   : > { %4235 = vmatprep.subr.bf16.mxu0 %v5220_v1 }
 0x1a3   : > { %4236 = vmatpush3.bf16.msra.mxu0 %v4634_v50 }
 0x1a4   : > { %4241 = vmatprep.subr.bf16.mxu0 %v5220_v1 }
 0x259   : > { %v716_v18 = vpop.f32.mrb[0].mxu0 }
 0x25a   : > { %v717_v19 = vadd.f32 %v716_v18, %v634_v17  ;;  %v4219_v20 = vpop.f32.mrb[1].mxu0  ;;  %v4658_v17 = vld [vmem:[#allocation8 + $0x140] ss:$12 sps:$4 sm:$0xff]  }
 0x25b   : > { %v719_v21 = vpop.f32.mrb[2].mxu0  ;;  %v4661_v18 = vld [vmem:[#allocation8 + $0x154] ss:$12 sps:$4 sm:$0xff]   ;;  %v4662_v20 = vld [vmem:[#allocation8 + $0x158] ss:$12 sps:$4 sm:$0xff]  }
 0x25c   : > { %724 = vadd.xlane.f32.xlu0 %v717_v19  ;;  %v4220_v22 = vpop.f32.mrb[3].mxu0  ;;  %v4665_v21 = vld [vmem:[#allocation8 + $0x16c] ss:$12 sps:$4 sm:$0xff]  }
 0x25d   : > { %v4663_v22 = vld [vmem:[#allocation8 + $0x168] ss:$12 sps:$4 sm:$0xff]  }
 0x2e9   : > { %v725_v32 = vpop.xlane.xlu0 %724 }
 0x2ea   : > { %v727_v33 = vmul.f32 0.0078125, %v725_v32 }
 0x2ec   : > { %v728_v34 = vsub.f32 %v717_v19, %v727_v33  ;;  %v4659_v19 = vld [vmem:[#allocation8 + $0x150] ss:$12 sps:$4 sm:$0xff]  }
 0x2ee   : > { %v729_v35 = vmul.f32 %v728_v34, %v728_v34 }
 0x2f0   : > { %730 = vadd.xlane.f32.xlu1 %v729_v35  ;;  %v820_v35 = vrot.slane %v813_v26, %v5663_v28 }
 0x37d   : > { %v731_v52 = vpop.xlane.xlu1 %730 }
 0x37e   : > { %v732_v53 = vmul.f32 0.0078125, %v731_v52 }
 0x380   : > { %v733_v54 = vadd.f32 1e-12, %v732_v53 }
 0x382   : > { %4859 = vrsqrt.f32 %v733_v54  ;;  %v832_v54 = vrot.slane %v814_v41, %v5663_v28 }
 0x38c   : > { %v4860_v55 = vpop.eup %4859 }
 0x38d   : > { %v735_v57 = vmul.f32 %v4860_v55, %v728_v34 }
 0x38f   : > { %v740_v59 = vmul.f32 %v3823_v56, %v735_v57 }
 0x391   : > { %v5632_v60 = vadd.f32 %v3824_v58, %v740_v59 }
 0x393   : > { %v748_v63 = vpack.c.bf16 %v5632_v60, %v5632_v60 }
 0x395   : > { %1008 = vmatmul.mubr.bf16.vlgmr.msra.gmra.mrb[0].mxu1 %v748_v63  ;;  %4238 = vmatmul.mubr.bf16.vlgmr.msra.gmra.mrb[4].mxu0 %v748_v63 }
 0x396   : > { %1185 = vmatpush1.bf16.msra.mxu1 %v4635_v61  ;;  %4242 = vmatpush3.bf16.msra.mxu0 %v4638_v62 }
 0x397   : > { %1186 = vmatprep.subr.bf16.mxu1 %v4641_v2  ;;  %4243 = vmatprep.subr.bf16.mxu0 %v5220_v1 }
 0x398   : > { %1216 = vmatprep.mubr.bf16.mxu1 %v5219_v0  ;;  %4257 = vmatprep.mubr.msk.bf16.mxu0 %vm5221_vm0, %v5220_v1 }
 0x39a   : > { %1187 = vmatpush1.bf16.msra.mxu1 %v4639_v3  ;;  %4244 = vmatpush3.bf16.msra.mxu0 %v4642_v4  ;;  %v5688_v3 = vld [vmem:[%s525_s18] ss:$0 sm:$0xff] }
 0x39b   : > { %1188 = vmatprep.subr.bf16.mxu1 %v4645_v5  ;;  %4245 = vmatprep.subr.bf16.mxu0 %v5220_v1 }
 0x39e   : > { %1189 = vmatpush1.bf16.msra.mxu1 %v4643_v6  ;;  %4246 = vmatpush3.bf16.msra.mxu0 %v4646_v7 }
 0x39f   : > { %1190 = vmatprep.subr.bf16.mxu1 %v4649_v8  ;;  %4247 = vmatprep.subr.bf16.mxu0 %v5220_v1 }
 0x3a2   : > { %1191 = vmatpush1.bf16.msra.mxu1 %v4647_v9  ;;  %4248 = vmatpush3.bf16.msra.mxu0 %v4650_v10 }
 0x3a3   : > { %1192 = vmatprep.subr.bf16.mxu1 %v4653_v12  ;;  %4249 = vmatprep.subr.bf16.mxu0 %v5220_v1 }
 0x3a6   : > { %1193 = vmatpush1.bf16.msra.mxu1 %v4651_v13  ;;  %4250 = vmatpush3.bf16.msra.mxu0 %v4654_v14 }
 0x3a7   : > { %1194 = vmatprep.subr.bf16.mxu1 %v4657_v15  ;;  %4251 = vmatprep.subr.bf16.mxu0 %v5220_v1 }
 0x3aa   : > { %1195 = vmatpush1.bf16.msra.mxu1 %v4655_v16  ;;  %4252 = vmatpush3.bf16.msra.mxu0 %v4658_v17 }
 0x3ab   : > { %1196 = vmatprep.subr.bf16.mxu1 %v4661_v18  ;;  %4253 = vmatprep.subr.bf16.mxu0 %v5220_v1 }
 0x3ae   : > { %1197 = vmatpush1.bf16.msra.mxu1 %v4659_v19  ;;  %4254 = vmatpush3.bf16.msra.mxu0 %v4662_v20 }
 0x3af   : > { %1198 = vmatprep.subr.bf16.mxu1 %v4665_v21  ;;  %4255 = vmatprep.subr.bf16.mxu0 %v5220_v1 }
 0x3b2   : > { %1199 = vmatpush1.bf16.msra.mxu1 %v4663_v22  ;;  %4256 = vmatpush3.bf16.msra.mxu0 %v4666_v23 }
 0x3b3   : > { %4261 = vmatprep.subr.bf16.mxu1 %v5220_v1  ;;  %4285 = vmatprep.subr.bf16.mxu0 %v5220_v1 }
 0x3b5   : > { %1217 = vmatmul.mubr.bf16.vlgmr.msra.gmra.mrb[4].mxu1 %v748_v63  ;;  %4258 = vmatmul.mubr.bf16.vlgmr.msra.gmra.mrb[8].mxu0 %v748_v63 }
 0x3b6   : > { %4263 = vmatprep.mubr.msk.bf16.mxu1 %vm5221_vm0, %v5220_v1  ;;  %4301 = vmatprep.mubr.msk.bf16.mxu0 %vm5221_vm0, %v5220_v1 }
 0x468   : > { %v1009_v29 = vpop.f32.mrb[0].mxu1  ;;  %v1050_v30 = vpop.f32.mrb[4].mxu0 }
 0x469   : > { %v1011_v31 = vpop.f32.mrb[1].mxu1  ;;  %v4239_v32 = vpop.f32.mrb[5].mxu0  ;;  %v1010_v39 = vadd.f32 %v1009_v29, %v820_v35  ;;  %v1051_v58 = vadd.f32 %v1050_v30, %v828_v47  ;;  %v4672_v35 = vld [vmem:[#allocation10 + $0x28] sm:$0xff]  }
 0x46a   : > { %v1012_v33 = vadd.f32 %v1011_v31, %v824_v27  ;;  %v1013_v34 = vpop.f32.mrb[2].mxu1  ;;  %v1053_v11 = vpop.f32.mrb[6].mxu0  ;;  %v4667_v31 = vld [vmem:[#allocation10] sm:$0xff]   ;;  %v4668_v32 = vld [vmem:[#allocation10 + $0x8] sm:$0xff]  }
 0x46b   : > { %v1014_v36 = vpop.f32.mrb[3].mxu1  ;;  %v4240_v37 = vpop.f32.mrb[7].mxu0  ;;  %v1265_v40 = vpack.c.bf16 %v1010_v39, %v1010_v39  ;;  %v1384_v61 = vpack.c.bf16 %v1051_v58, %v1051_v58  ;;  %4286 = vmatpush3.bf16.msra.mxu0 %v4667_v31  ;;  %v4670_v34 = vld [vmem:[#allocation10 + $0x18] sm:$0xff]   ;;  %v4671_v11 = vld [vmem:[#allocation10 + $0x20] sm:$0xff]  }
 0x46c   : > { %v1267_v38 = vpack.c.bf16 %v1012_v33, %v1012_v33  ;;  %4287 = vmatprep.subr.bf16.mxu0 %v5220_v1  ;;  %v4669_v33 = vld [vmem:[#allocation10 + $0x10] sm:$0xff]  }
 0x46d   : > { %v1391_v63 = vsel %vm1389_vm4, %v1384_v61, 0  ;;  %v4673_v36 = vld [vmem:[#allocation10 + $0x30] sm:$0xff]  }
 0x46e   : > { %4262 = vmatpush3.bf16.xpose.msra.mxu1 %v1267_v38 }
 0x46f   : > { %4267 = vmatprep.subr.bf16.mxu1 %v5220_v1  ;;  %4288 = vmatpush3.bf16.msra.mxu0 %v4668_v32 }
 0x470   : > { %4289 = vmatprep.subr.bf16.mxu0 %v5220_v1 }
 0x473   : > { %4290 = vmatpush3.bf16.msra.mxu0 %v4669_v33 }
 0x474   : > { %4291 = vmatprep.subr.bf16.mxu0 %v5220_v1 }
 0x475   : > { %4264 = vmatmul.mubr.bf16.vlgmr.msra.gmra.mrb[8].mxu1 %v1265_v40 }
 0x476   : > { %4269 = vmatprep.mubr.msk.bf16.mxu1 %vm5221_vm0, %v5220_v1 }
 0x477   : > { %4292 = vmatpush3.bf16.msra.mxu0 %v4670_v34  ;;  %v4694_v34 = vld [vmem:[#allocation11 + $0x34] ss:$8 sps:$4 sm:$0xff]  }
 0x478   : > { %4293 = vmatprep.subr.bf16.mxu0 %v5220_v1 }
 0x47b   : > { %4294 = vmatpush3.bf16.msra.mxu0 %v4671_v11  ;;  %v4697_v11 = vld [vmem:[#allocation11 + $0x44] ss:$8 sps:$4 sm:$0xff]  }
 0x47c   : > { %4295 = vmatprep.subr.bf16.mxu0 %v5220_v1 }
 0x47f   : > { %4296 = vmatpush3.bf16.msra.mxu0 %v4672_v35  ;;  %v4695_v35 = vld [vmem:[#allocation11 + $0x40] ss:$8 sps:$4 sm:$0xff]  }
 0x480   : > { %4297 = vmatprep.subr.bf16.mxu0 %v5220_v1 }
 0x483   : > { %4298 = vmatpush3.bf16.msra.mxu0 %v4673_v36  ;;  %v4700_v36 = vld [vmem:[#allocation11 + $0x54] ss:$8 sps:$4 sm:$0xff]  }
 0x484   : > { %4299 = vmatprep.subr.bf16.mxu0 %v5220_v1 }
 0x488   : > { %v1218_v45 = vpop.f32.mrb[4].mxu1  ;;  %v1259_v46 = vpop.f32.mrb[8].mxu0 }
 0x489   : > { %v5678_v48 = vadd.f32 %v1259_v46, %v840_v43  ;;  %v1220_v49 = vpop.f32.mrb[5].mxu1  ;;  %v4259_v50 = vpop.f32.mrb[9].mxu0  ;;  %v1219_v59 = vadd.f32 %v1218_v45, %v832_v54  ;;  %v4680_v54 = vld [vmem:[#allocation10 + $0x68] sm:$0xff]  }
 0x48a   : > { %v1221_v51 = vadd.f32 %v1220_v49, %v836_v44  ;;  %v1222_v52 = vpop.f32.mrb[6].mxu1  ;;  %v1262_v53 = vpop.f32.mrb[10].mxu0  ;;  %v4675_v49 = vld [vmem:[#allocation10 + $0x40] sm:$0xff]   ;;  %v4676_v50 = vld [vmem:[#allocation10 + $0x48] sm:$0xff]  }
 0x48b   : > { %v1223_v55 = vpop.f32.mrb[7].mxu1  ;;  %v4260_v56 = vpop.f32.mrb[11].mxu0  ;;  %v1266_v62 = vpack.c.bf16 %v1219_v59, %v1219_v59  ;;  %v1385_v39 = vpack.c.bf16 %v5678_v48, %v5678_v48  ;;  %v4674_v48 = vld [vmem:[#allocation10 + $0x38] sm:$0xff]   ;;  %v4679_v53 = vld [vmem:[#allocation10 + $0x60] sm:$0xff]  }
 0x48c   : > { %v1268_v57 = vpack.c.bf16 %v1221_v51, %v1221_v51  ;;  %4300 = vmatpush3.bf16.msra.mxu0 %v4674_v48  ;;  %v4677_v51 = vld [vmem:[#allocation10 + $0x50] sm:$0xff]   ;;  %v4678_v52 = vld [vmem:[#allocation10 + $0x58] sm:$0xff]  }
 0x48d   : > { %v1437_v43 = vsel %vm1389_vm4, %v1385_v39, 0  ;;  %v4681_v55 = vld [vmem:[#allocation10 + $0x70] sm:$0xff]   ;;  %v4682_v56 = vld [vmem:[#allocation10 + $0x78] sm:$0xff]   ;;  %v4701_v39 = vld [vmem:[#allocation11 + $0x60] ss:$8 sps:$4 sm:$0xff]  }
 0x48e   : > { %4268 = vmatpush3.bf16.xpose.msra.mxu1 %v1268_v57 }
 0x48f   : > { %4273 = vmatprep.subr.bf16.mxu1 %v5220_v1 }
 0x495   : > { %4270 = vmatmul.mubr.bf16.vlgmr.msra.gmra.mrb[12].mxu1 %v1266_v62 }
 0x496   : > { %4274 = vmatpush3.bf16.msra.mxu1 %v1391_v63  ;;  %4275 = vmatprep.mubr.msk.bf16.mxu1 %vm5221_vm0, %v5220_v1 }
 0x497   : > { %4279 = vmatprep.subr.bf16.mxu1 %v5220_v1 }
 0x548   : > { %v1303_v2 = vpop.f32.mrb[8].mxu1 }
 0x549   : > { %v1349_v4 = vmul.f32 0.125, %v1303_v2  ;;  %v4265_v5 = vpop.f32.mrb[9].mxu1 }
 0x54a   : > { %v1306_v6 = vpop.f32.mrb[10].mxu1 }
 0x54b   : > { %v4266_v7 = vpop.f32.mrb[11].mxu1  ;;  %v1357_v8 = vadd.f32 %v5688_v3, %v1349_v4 }
 0x54d   : > { %v1360_v9 = vsel %vm1359_vm5, %v1357_v8, -inf }
 0x54e   : > { %1361 = vmax.xlane.f32.xlu1 %v1360_v9 }
 0x568   : > { %v1343_v10 = vpop.f32.mrb[12].mxu1 }
 0x569   : > { %v1350_v12 = vmul.f32 0.125, %v1343_v10  ;;  %v4271_v13 = vpop.f32.mrb[13].mxu1 }
 0x56a   : > { %v1346_v14 = vpop.f32.mrb[14].mxu1 }
 0x56b   : > { %v4272_v15 = vpop.f32.mrb[15].mxu1  ;;  %v1358_v16 = vadd.f32 %v5688_v3, %v1350_v12  ;;  %v5724_v12 = vld [vmem:[%s6006_s28] sm:$0xff] }
 0x56c   : > { %v1693_v13 = vrot.slane %v5724_v12, %v5663_v28 }
 0x56d   : > { %v1363_v17 = vsel %vm1359_vm5, %v1358_v16, -inf }
 0x56e   : > { %1364 = vmax.xlane.f32.xlu1 %v1363_v17 }
 0x5db   : > { %v1362_v18 = vpop.xlane.xlu1 %1361 }
 0x5dc   : > { %v1366_v19 = vsub.f32 %v1357_v8, %v1362_v18 }
 0x5de   : > { %v1368_v20 = vmul.f32 1.442695, %v1366_v19 }
 0x5e0   : > { %4861 = vpow2.f32 %v1368_v20 }
 0x5ea   : > { %v4862_v21 = vpop.eup %4861 }
 0x5eb   : > { %v1372_v22 = vsel %vm1359_vm5, %v4862_v21, 0.0 }
 0x5ec   : > { %1373 = vadd.xlane.f32.xlu1 %v1372_v22  ;;  %v4685_v22 = vld [vmem:[#allocation11 + $0x4] ss:$8 sps:$4 sm:$0xff]  }
 0x5ed   : > { %1826 = vmatprep.subr.bf16.mxu0 %v4685_v22 }
 0x5fb   : > { %v1365_v23 = vpop.xlane.xlu1 %1364 }
 0x5fc   : > { %v1367_v26 = vsub.f32 %v1358_v16, %v1365_v23  ;;  %v4688_v23 = vld [vmem:[#allocation11 + $0x14] ss:$8 sps:$4 sm:$0xff]  }
 0x5fe   : > { %v1370_v27 = vmul.f32 1.442695, %v1367_v26  ;;  %v4686_v26 = vld [vmem:[#allocation11 + $0x10] ss:$8 sps:$4 sm:$0xff]  }
 0x600   : > { %4863 = vpow2.f32 %v1370_v27  ;;  %v4691_v27 = vld [vmem:[#allocation11 + $0x24] ss:$8 sps:$4 sm:$0xff]  }
 0x60a   : > { %v4864_v29 = vpop.eup %4863 }
 0x60b   : > { %v1375_v30 = vsel %vm1359_vm5, %v4864_v29, 0.0 }
 0x60c   : > { %1376 = vadd.xlane.f32.xlu1 %v1375_v30 }
 0x679   : > { %v1374_v37 = vpop.xlane.xlu1 %1373 }
 0x67a   : > { %4865 = vrcp.f32 %v1374_v37  ;;  %v4698_v37 = vld [vmem:[#allocation11 + $0x50] ss:$8 sps:$4 sm:$0xff]  }
 0x684   : > { %v4866_v38 = vpop.eup %4865 }
 0x685   : > { %v1379_v40 = vmul.f32 %v4866_v38, %v4862_v21  ;;  %v4683_v21 = vld [vmem:[#allocation11] ss:$8 sps:$4 sm:$0xff]   ;;  %v4703_v38 = vld [vmem:[#allocation11 + $0x64] ss:$8 sps:$4 sm:$0xff]  }
 0x687   : > { %v1382_v41 = vpack.c.bf16 %v1379_v40, %v1379_v40  ;;  %v4706_v40 = vld [vmem:[#allocation11 + $0x74] ss:$8 sps:$4 sm:$0xff]  }
 0x689   : > { %4276 = vmatmul.mubr.msk.bf16.vlgmr.msra.gmra.mrb[16].mxu1 %vm1359_vm5, %v1382_v41  ;;  %v4704_v41 = vld [vmem:[#allocation11 + $0x70] ss:$8 sps:$4 sm:$0xff]  }
 0x68a   : > { %4280 = vmatpush3.bf16.msra.mxu1 %v1437_v43  ;;  %4281 = vmatprep.mubr.msk.bf16.mxu1 %vm5221_vm0, %v5220_v1 }
 0x68b   : > { %4305 = vmatprep.subr.bf16.mxu1 %v5220_v1 }
 0x699   : > { %v1377_v44 = vpop.xlane.xlu1 %1376 }
 0x69a   : > { %4867 = vrcp.f32 %v1377_v44 }
 0x6a4   : > { %v4868_v45 = vpop.eup %4867 }
 0x6a5   : > { %v1381_v46 = vmul.f32 %v4868_v45, %v4864_v29  ;;  %v4689_v29 = vld [vmem:[#allocation11 + $0x20] ss:$8 sps:$4 sm:$0xff]  }
 0x6a7   : > { %v1383_v47 = vpack.c.bf16 %v1381_v46, %v1381_v46  ;;  %v1710_v46 = vrot.slane %v5724_v12, %v5656_v25 }
 0x6a9   : > { %4282 = vmatmul.mubr.msk.bf16.vlgmr.msra.gmra.mrb[20].mxu1 %vm1359_vm5, %v1383_v47 }
 0x6aa   : > { %4321 = vmatprep.mubr.msk.bf16.mxu1 %vm5221_vm0, %v5220_v1  ;;  %4306 = vmatpush3.bf16.msra.mxu1 %v4675_v49  ;;  %v1715_v49 = vrot.slane %v5724_v12, %v5673_v42 }
 0x6ab   : > { %4307 = vmatprep.subr.bf16.mxu1 %v5220_v1 }
 0x6ae   : > { %4308 = vmatpush3.bf16.msra.mxu1 %v4676_v50 }
 0x6af   : > { %4309 = vmatprep.subr.bf16.mxu1 %v5220_v1 }
 0x6b2   : > { %4310 = vmatpush3.bf16.msra.mxu1 %v4677_v51 }
 0x6b3   : > { %4311 = vmatprep.subr.bf16.mxu1 %v5220_v1 }
 0x6b6   : > { %4312 = vmatpush3.bf16.msra.mxu1 %v4678_v52 }
 0x6b7   : > { %4313 = vmatprep.subr.bf16.mxu1 %v5220_v1 }
 0x6ba   : > { %4314 = vmatpush3.bf16.msra.mxu1 %v4679_v53  ;;  %v4707_v53 = vld [vmem:[#allocation13 + $0x40] sm:$0xff]  }
 0x6bb   : > { %4315 = vmatprep.subr.bf16.mxu1 %v5220_v1 }
 0x6be   : > { %4316 = vmatpush3.bf16.msra.mxu1 %v4680_v54  ;;  %v4708_v54 = vld [vmem:[#allocation13] sm:$0xff]  }
 0x6bf   : > { %4317 = vmatprep.subr.bf16.mxu1 %v5220_v1 }
 0x6c2   : > { %4318 = vmatpush3.bf16.msra.mxu1 %v4681_v55  ;;  %v4709_v55 = vld [vmem:[#allocation13 + $0x48] sm:$0xff]  }
 0x6c3   : > { %4319 = vmatprep.subr.bf16.mxu1 %v5220_v1 }
 0x6c6   : > { %4320 = vmatpush3.bf16.msra.mxu1 %v4682_v56  ;;  %v4710_v56 = vld [vmem:[#allocation13 + $0x8] sm:$0xff]  }
 0x6c7   : > { %4097 = vmatprep.subr.bf16.mxu1 %v4707_v53  ;;  %v4725_v53 = vld [vmem:[#allocation8 + $0x184] ss:$12 sps:$4 sm:$0xff]  }
 0x75c   : > { %v1427_v57 = vpop.f32.mrb[16].mxu1 }
 0x75d   : > { %v1479_v58 = vpack.c.bf16 %v1427_v57, %v1427_v57  ;;  %v4277_v59 = vpop.f32.mrb[17].mxu1  ;;  %v4711_v57 = vld [vmem:[#allocation13 + $0x50] sm:$0xff]  }
 0x75e   : > { %v1430_v61 = vpop.f32.mrb[18].mxu1  ;;  %v4713_v59 = vld [vmem:[#allocation13 + $0x58] sm:$0xff]  }
 0x75f   : > { %v4278_v62 = vpop.f32.mrb[19].mxu1  ;;  %4302 = vmatmul.mubr.bf16.vlgmr.msra.gmra.mrb[12].mxu0 %v1479_v58  ;;  %v4712_v58 = vld [vmem:[#allocation13 + $0x10] sm:$0xff]   ;;  %v4714_v61 = vld [vmem:[#allocation13 + $0x18] sm:$0xff]  }
 0x760   : > { %1858 = vmatprep.mubr.bf16.mxu0 %v5219_v0  ;;  %1827 = vmatpush1.bf16.msra.mxu0 %v4683_v21  ;;  %v4715_v62 = vld [vmem:[#allocation13 + $0x60] sm:$0xff]  }
 0x761   : > { %1828 = vmatprep.subr.bf16.mxu0 %v4688_v23 }
 0x764   : > { %1829 = vmatpush1.bf16.msra.mxu0 %v4686_v26 }
 0x765   : > { %1830 = vmatprep.subr.bf16.mxu0 %v4691_v27 }
 0x768   : > { %1831 = vmatpush1.bf16.msra.mxu0 %v4689_v29 }
 0x769   : > { %1832 = vmatprep.subr.bf16.mxu0 %v4694_v34 }
 0x77c   : > { %v1473_v63 = vpop.f32.mrb[20].mxu1 }
 0x77d   : > { %v1480_v2 = vpack.c.bf16 %v1473_v63, %v1473_v63  ;;  %v4283_v4 = vpop.f32.mrb[21].mxu1  ;;  %v4716_v63 = vld [vmem:[#allocation13 + $0x20] sm:$0xff]  }
 0x77e   : > { %v1476_v5 = vpop.f32.mrb[22].mxu1  ;;  %v4718_v4 = vld [vmem:[#allocation13 + $0x28] sm:$0xff]  }
 0x77f   : > { %v4284_v6 = vpop.f32.mrb[23].mxu1  ;;  %4322 = vmatmul.mubr.bf16.vlgmr.msra.gmra.mrb[24].mxu1 %v1480_v2  ;;  %v4717_v2 = vld [vmem:[#allocation13 + $0x68] sm:$0xff]   ;;  %v4719_v5 = vld [vmem:[#allocation13 + $0x70] sm:$0xff]  }
 0x780   : > { %4098 = vmatpush3.bf16.msra.mxu1 %v4708_v54  ;;  %v4720_v6 = vld [vmem:[#allocation13 + $0x30] sm:$0xff]  }
 0x781   : > { %4099 = vmatprep.subr.bf16.mxu1 %v4709_v55  ;;  %v4726_v54 = vld [vmem:[#allocation8 + $0x188] ss:$12 sps:$4 sm:$0xff]  }
 0x782   : > { %v4729_v55 = vld [vmem:[#allocation8 + $0x19c] ss:$12 sps:$4 sm:$0xff]  }
 0x784   : > { %4100 = vmatpush3.bf16.msra.mxu1 %v4710_v56  ;;  %v4730_v56 = vld [vmem:[#allocation8 + $0x1a0] ss:$12 sps:$4 sm:$0xff]  }
 0x785   : > { %4101 = vmatprep.subr.bf16.mxu1 %v4711_v57  ;;  %v4727_v57 = vld [vmem:[#allocation8 + $0x198] ss:$12 sps:$4 sm:$0xff]  }
 0x788   : > { %4102 = vmatpush3.bf16.msra.mxu1 %v4712_v58  ;;  %v4733_v58 = vld [vmem:[#allocation8 + $0x1b4] ss:$12 sps:$4 sm:$0xff]  }
 0x789   : > { %4103 = vmatprep.subr.bf16.mxu1 %v4713_v59  ;;  %v4734_v59 = vld [vmem:[#allocation8 + $0x1b8] ss:$12 sps:$4 sm:$0xff]  }
 0x78c   : > { %4104 = vmatpush3.bf16.msra.mxu1 %v4714_v61  ;;  %v4731_v61 = vld [vmem:[#allocation8 + $0x1b0] ss:$12 sps:$4 sm:$0xff]  }
 0x78d   : > { %4105 = vmatprep.subr.bf16.mxu1 %v4715_v62 }
 0x790   : > { %4106 = vmatpush3.bf16.msra.mxu1 %v4716_v63 }
 0x791   : > { %4107 = vmatprep.subr.bf16.mxu1 %v4717_v2 }
 0x794   : > { %4108 = vmatpush3.bf16.msra.mxu1 %v4718_v4  ;;  %v4737_v4 = vld [vmem:[#allocation8 + $0x1cc] ss:$12 sps:$4 sm:$0xff]  }
 0x795   : > { %4109 = vmatprep.subr.bf16.mxu1 %v4719_v5  ;;  %v4735_v5 = vld [vmem:[#allocation8 + $0x1c8] ss:$12 sps:$4 sm:$0xff]  }
 0x798   : > { %4110 = vmatpush3.bf16.msra.mxu1 %v4720_v6  ;;  %v4738_v6 = vld [vmem:[#allocation8 + $0x1d0] ss:$12 sps:$4 sm:$0xff]  }
 0x832   : > { %v1595_v7 = vpop.f32.mrb[12].mxu0 }
 0x833   : > { %v4303_v8 = vpop.f32.mrb[13].mxu0 }
 0x834   : > { %v1598_v9 = vpop.f32.mrb[14].mxu0  ;;  %v4722_v8 = vld [vmem:[#allocation13 + $0x38] sm:$0xff]  }
 0x835   : > { %v4304_v10 = vpop.f32.mrb[15].mxu0  ;;  %v1734_v9 = vld [vmem:[%s6007_s14] sm:$0x3] }
 0x836   : > { %v1739_v10 = vrot.slane %v1734_v9, %v5663_v28 }
 0x852   : > { %v1683_v14 = vpop.f32.mrb[24].mxu1 }
 0x853   : > { %v1689_v15 = vadd.f32 %v1683_v14, %v1595_v7  ;;  %v4323_v16 = vpop.f32.mrb[25].mxu1  ;;  %v4721_v7 = vld [vmem:[#allocation13 + $0x78] sm:$0xff]  }
 0x854   : > { %v1686_v17 = vpop.f32.mrb[26].mxu1  ;;  %4111 = vmatprep.subr.bf16.mxu1 %v4721_v7  ;;  %v4741_v7 = vld [vmem:[#allocation8 + $0x1e4] ss:$12 sps:$4 sm:$0xff]  }
 0x855   : > { %v1694_v18 = vadd.f32 %v1693_v13, %v1689_v15  ;;  %v4324_v19 = vpop.f32.mrb[27].mxu1  ;;  %4112 = vmatpush3.bf16.msra.mxu1 %v4722_v8  ;;  %v1743_v13 = vrot.slane %v1734_v9, %v5656_v25  ;;  %v4739_v8 = vld [vmem:[#allocation8 + $0x1e0] ss:$12 sps:$4 sm:$0xff]   ;;  %v4742_v9 = vld [vmem:[#allocation8 + $0x1e8] ss:$12 sps:$4 sm:$0xff]  }
 0x856   : > { %4325 = vmatprep.subr.bf16.mxu1 %v5220_v1 }
 0x857   : > { %v1695_v20 = vadd.f32 %v1694_v18, %v5632_v60  ;;  %v4692_v60 = vld [vmem:[#allocation11 + $0x30] ss:$8 sps:$4 sm:$0xff]  }
 0x858   : > { %1833 = vmatpush1.bf16.msra.mxu0 %v4692_v60 }
 0x859   : > { %1696 = vadd.xlane.f32.xlu1 %v1695_v20  ;;  %1834 = vmatprep.subr.bf16.mxu0 %v4697_v11 }
 0x85c   : > { %1835 = vmatpush1.bf16.msra.mxu0 %v4695_v35 }
 0x85d   : > { %1836 = vmatprep.subr.bf16.mxu0 %v4700_v36 }
 0x860   : > { %1837 = vmatpush1.bf16.msra.mxu0 %v4698_v37 }
 0x861   : > { %1838 = vmatprep.subr.bf16.mxu0 %v4703_v38 }
 0x864   : > { %1839 = vmatpush1.bf16.msra.mxu0 %v4701_v39 }
 0x865   : > { %1840 = vmatprep.subr.bf16.mxu0 %v4706_v40 }
 0x868   : > { %1841 = vmatpush1.bf16.msra.mxu0 %v4704_v41  ;;  %v1921_v41 = vsub.s32 3, %v5653_v24 }
 0x869   : > { %2312 = vmatprep.subr.bf16.mxu0 %v4725_v53  ;;  %v4778_v53 = vld [vmem:[#allocation8 + $0x2c0] ss:$12 sps:$4 sm:$0xff]  }
 0x8e6   : > { %v1697_v30 = vpop.xlane.xlu1 %1696 }
 0x8e7   : > { %v1698_v31 = vmul.f32 0.0078125, %v1697_v30 }
 0x8e9   : > { %v1699_v32 = vsub.f32 %v1695_v20, %v1698_v31 }
 0x8eb   : > { %v1700_v33 = vmul.f32 %v1699_v32, %v1699_v32 }
 0x8ed   : > { %1701 = vadd.xlane.f32.xlu1 %v1700_v33 }
 0x97a   : > { %v1702_v43 = vpop.xlane.xlu1 %1701 }
 0x97b   : > { %v1703_v44 = vmul.f32 0.0078125, %v1702_v43 }
 0x97d   : > { %v1704_v45 = vadd.f32 1e-12, %v1703_v44  ;;  %v1922_v44 = vrot.slane %v5724_v12, %v1921_v41 }
 0x97f   : > { %4869 = vrsqrt.f32 %v1704_v45 }
 0x989   : > { %v4870_v47 = vpop.eup %4869 }
 0x98a   : > { %v1706_v48 = vmul.f32 %v4870_v47, %v1699_v32 }
 0x98c   : > { %v1711_v50 = vmul.f32 %v1710_v46, %v1706_v48 }
 0x98e   : > { %v5733_v51 = vadd.f32 %v1715_v49, %v1711_v50 }
 0x990   : > { %v1717_v52 = vpack.c.bf16 %v5733_v51, %v5733_v51 }
 0x992   : > { %1859 = vmatmul.mubr.bf16.vlgmr.msra.gmra.mrb[16].mxu0 %v1717_v52  ;;  %v4723_v52 = vld [vmem:[#allocation8 + $0x180] ss:$12 sps:$4 sm:$0xff]  }
 0x993   : > { %2344 = vmatprep.mubr.bf16.mxu0 %v5219_v0  ;;  %2313 = vmatpush1.bf16.msra.mxu0 %v4723_v52  ;;  %v4775_v52 = vld [vmem:[#allocation8 + $0x2b8] ss:$12 sps:$4 sm:$0xff]  }
 0x994   : > { %2314 = vmatprep.subr.bf16.mxu0 %v4729_v55  ;;  %v4779_v55 = vld [vmem:[#allocation8 + $0x2d0] ss:$12 sps:$4 sm:$0xff]  }
 0x997   : > { %2315 = vmatpush1.bf16.msra.mxu0 %v4727_v57  ;;  %v4785_v57 = vld [vmem:[#allocation8 + $0x2ec] ss:$12 sps:$4 sm:$0xff]  }
 0x998   : > { %2316 = vmatprep.subr.bf16.mxu0 %v4733_v58  ;;  %v4783_v58 = vld [vmem:[#allocation8 + $0x2e8] ss:$12 sps:$4 sm:$0xff]  }
 0x99b   : > { %2317 = vmatpush1.bf16.msra.mxu0 %v4731_v61  ;;  %v3925_v61 = vld [vmem:[%s6005_s17 + $0x6] sm:$0x7] }
 0x99c   : > { %2318 = vmatprep.subr.bf16.mxu0 %v4737_v4 }
 0x99f   : > { %2319 = vmatpush1.bf16.msra.mxu0 %v4735_v5 }
 0x9a0   : > { %2320 = vmatprep.subr.bf16.mxu0 %v4741_v7 }
 0x9a3   : > { %2321 = vmatpush1.bf16.msra.mxu0 %v4739_v8 }
 0xa65   : > { %v1860_v14 = vpop.f32.mrb[16].mxu0 }
 0xa66   : > { %v1861_v15 = vadd.f32 %v1860_v14, %v1739_v10  ;;  %v1862_v16 = vpop.f32.mrb[17].mxu0  ;;  %v4745_v10 = vld [vmem:[#allocation8 + $0x1fc] ss:$12 sps:$4 sm:$0xff]   ;;  %v4746_v14 = vld [vmem:[#allocation8 + $0x200] ss:$12 sps:$4 sm:$0xff]  }
 0xa67   : > { %v1863_v17 = vadd.f32 %v1862_v16, %v1743_v13  ;;  %v1864_v18 = vpop.f32.mrb[18].mxu0  ;;  %v4743_v13 = vld [vmem:[#allocation8 + $0x1f8] ss:$12 sps:$4 sm:$0xff]   ;;  %2322 = vmatprep.subr.bf16.mxu0 %v4745_v10  ;;  %v4747_v16 = vld [vmem:[#allocation8 + $0x210] ss:$12 sps:$4 sm:$0xff]  }
 0xa68   : > { %v1869_v19 = vmul.f32 0.044715, %v1861_v15  ;;  %v1865_v20 = vpop.f32.mrb[19].mxu0  ;;  %v1867_v60 = vmul.f32 0.5, %v1861_v15  ;;  %2323 = vmatpush1.bf16.msra.mxu0 %v4743_v13  ;;  %v4751_v18 = vld [vmem:[#allocation8 + $0x228] ss:$12 sps:$4 sm:$0xff]  }
 0xa69   : > { %v1870_v21 = vmul.f32 0.044715, %v1863_v17  ;;  %v1868_v35 = vmul.f32 0.5, %v1863_v17  ;;  %v4754_v20 = vld [vmem:[#allocation8 + $0x230] ss:$12 sps:$4 sm:$0xff]  }
 0xa6a   : > { %v1871_v22 = vmul.f32 %v1869_v19, %v1861_v15  ;;  %v4753_v19 = vld [vmem:[#allocation8 + $0x22c] ss:$12 sps:$4 sm:$0xff]  }
 0xa6b   : > { %v1872_v23 = vmul.f32 %v1870_v21, %v1863_v17  ;;  %v4757_v21 = vld [vmem:[#allocation8 + $0x244] ss:$12 sps:$4 sm:$0xff]  }
 0xa6c   : > { %v1873_v26 = vmul.f32 %v1871_v22, %v1861_v15 }
 0xa6d   : > { %v1874_v27 = vmul.f32 %v1872_v23, %v1863_v17 }
 0xa6e   : > { %v1875_v29 = vadd.f32 %v1873_v26, %v1861_v15  ;;  %v4749_v15 = vld [vmem:[#allocation8 + $0x214] ss:$12 sps:$4 sm:$0xff]  }
 0xa6f   : > { %v1876_v30 = vadd.f32 %v1874_v27, %v1863_v17  ;;  %v4750_v17 = vld [vmem:[#allocation8 + $0x218] ss:$12 sps:$4 sm:$0xff]   ;;  %2324 = vmatprep.subr.bf16.mxu0 %v4749_v15  ;;  %v2073_v27 = vsub.s32 4, %v5653_v24 }
 0xa70   : > { %v1877_v31 = vmul.f32 0.7978846, %v1875_v29  ;;  %2325 = vmatpush1.bf16.msra.mxu0 %v4747_v16  ;;  %v2078_v29 = vsub.s32 5, %v5653_v24  ;;  %v3431_v24 = vld [vmem:[%s6004_s4 + $0x2] sm:$0x1] }
 0xa71   : > { %v1878_v32 = vmul.f32 0.7978846, %v1876_v30  ;;  %2326 = vmatprep.subr.bf16.mxu0 %v4753_v19  ;;  %v2074_v30 = vrot.slane %v5724_v12, %v2073_v27 }
 0xa72   : > { %4871 = vtanh.f32 %v1877_v31 }
 0xa73   : > { %4873 = vtanh.f32 %v1878_v32 }
 0xa74   : > { %2327 = vmatpush1.bf16.msra.mxu0 %v4751_v18 }
 0xa75   : > { %2521 = vmatprep.subr.bf16.mxu0 %v4757_v21 }
 0xa7c   : > { %v4872_v33 = vpop.eup %4871 }
 0xa7d   : > { %v4874_v34 = vpop.eup %4873  ;;  %v1881_v11 = vadd.f32 1.0, %v4872_v33  ;;  %v2079_v33 = vrot.slane %v5724_v12, %v2078_v29  ;;  %v4763_v12 = vld [vmem:[#allocation8 + $0x270] ss:$12 sps:$4 sm:$0xff]  }
 0xa7e   : > { %v1882_v36 = vadd.f32 1.0, %v4874_v34 }
 0xa7f   : > { %v1883_v37 = vmul.f32 %v1881_v11, %v1867_v60  ;;  %v4755_v11 = vld [vmem:[#allocation8 + $0x240] ss:$12 sps:$4 sm:$0xff]  }
 0xa80   : > { %v1884_v38 = vmul.f32 %v1882_v36, %v1868_v35  ;;  %v4758_v35 = vld [vmem:[#allocation8 + $0x248] ss:$12 sps:$4 sm:$0xff]  }
 0xa81   : > { %v1885_v40 = vpack.c.bf16 %v1883_v37, %v1883_v37  ;;  %v4761_v37 = vld [vmem:[#allocation8 + $0x25c] ss:$12 sps:$4 sm:$0xff]  }
 0xa82   : > { %v1886_v39 = vpack.c.bf16 %v1884_v38, %v1884_v38  ;;  %v4759_v38 = vld [vmem:[#allocation8 + $0x258] ss:$12 sps:$4 sm:$0xff]  }
 0xa84   : > { %2051 = vmatprep.mubr.bf16.mxu1 %v1886_v39  ;;  %v4762_v39 = vld [vmem:[#allocation8 + $0x260] ss:$12 sps:$4 sm:$0xff]  }
 0xa85   : > { %2052 = vmatmul.mubr.bf16.vlgmr.msra.gmra.mrb[28].mxu1 %v1885_v40  ;;  %v4765_v40 = vld [vmem:[#allocation8 + $0x274] ss:$12 sps:$4 sm:$0xff]  }
 0xa86   : > { %4341 = vmatprep.mubr.msk.bf16.mxu1 %vm5221_vm0, %v5220_v1  ;;  %4326 = vmatpush3.bf16.msra.mxu1 %v4726_v54  ;;  %v4781_v54 = vld [vmem:[#allocation8 + $0x2d4] ss:$12 sps:$4 sm:$0xff]  }
 0xa87   : > { %4327 = vmatprep.subr.bf16.mxu1 %v5220_v1 }
 0xa8a   : > { %4328 = vmatpush3.bf16.msra.mxu1 %v4730_v56  ;;  %v4782_v56 = vld [vmem:[#allocation8 + $0x2d8] ss:$12 sps:$4 sm:$0xff]  }
 0xa8b   : > { %4329 = vmatprep.subr.bf16.mxu1 %v5220_v1 }
 0xa8e   : > { %4330 = vmatpush3.bf16.msra.mxu1 %v4734_v59  ;;  %v4786_v59 = vld [vmem:[#allocation8 + $0x2f0] ss:$12 sps:$4 sm:$0xff]  }
 0xa8f   : > { %4331 = vmatprep.subr.bf16.mxu1 %v5220_v1 }
 0xa92   : > { %4332 = vmatpush3.bf16.msra.mxu1 %v4738_v6 }
 0xa93   : > { %4333 = vmatprep.subr.bf16.mxu1 %v5220_v1 }
 0xa96   : > { %4334 = vmatpush3.bf16.msra.mxu1 %v4742_v9  ;;  %v2157_v9 = vrot.slane %v3925_v61, %v5663_v28 }
 0xa97   : > { %4335 = vmatprep.subr.bf16.mxu1 %v5220_v1 }
 0xa9a   : > { %4336 = vmatpush3.bf16.msra.mxu1 %v4746_v14 }
 0xa9b   : > { %4337 = vmatprep.subr.bf16.mxu1 %v5220_v1 }
 0xa9e   : > { %4338 = vmatpush3.bf16.msra.mxu1 %v4750_v17 }
 0xa9f   : > { %4339 = vmatprep.subr.bf16.mxu1 %v5220_v1 }
 0xaa2   : > { %4340 = vmatpush3.bf16.msra.mxu1 %v4754_v20  ;;  %v3926_v20 = vld [vmem:[%s6005_s17 + $0x9] sm:$0x7] }
 0xaa3   : > { %4345 = vmatprep.subr.bf16.mxu1 %v5220_v1  ;;  %v2173_v21 = vrot.slane %v3926_v20, %v5656_v25 }
 0xb58   : > { %v4113_v43 = vpop.f32.mrb[28].mxu1 }
 0xb59   : > { %v4114_v45 = vpop.f32.mrb[29].mxu1 }
 0xb5a   : > { %v4115_v46 = vadd.f32 %v4114_v45, %v4113_v43  ;;  %v4116_v47 = vpop.f32.mrb[30].mxu1  ;;  %v4766_v43 = vld [vmem:[#allocation8 + $0x278] ss:$12 sps:$4 sm:$0xff]   ;;  %v4767_v45 = vld [vmem:[#allocation8 + $0x288] ss:$12 sps:$4 sm:$0xff]  }
 0xb5b   : > { %v4117_v48 = vpop.f32.mrb[31].mxu1  ;;  %v4773_v47 = vld [vmem:[#allocation8 + $0x2a4] ss:$12 sps:$4 sm:$0xff]  }
 0xb5c   : > { %v2054_v49 = vadd.f32 %v4115_v46, %v1922_v44  ;;  %v4769_v44 = vld [vmem:[#allocation8 + $0x28c] ss:$12 sps:$4 sm:$0xff]   ;;  %v4770_v46 = vld [vmem:[#allocation8 + $0x290] ss:$12 sps:$4 sm:$0xff]  }
 0xb5d   : > { %v4771_v48 = vld [vmem:[#allocation8 + $0x2a0] ss:$12 sps:$4 sm:$0xff]  }
 0xb5e   : > { %v2059_v50 = vadd.f32 %v2054_v49, %v5733_v51  ;;  %v4774_v49 = vld [vmem:[#allocation8 + $0x2a8] ss:$12 sps:$4 sm:$0xff]  }
 0xb60   : > { %2060 = vadd.xlane.f32.xlu1 %v2059_v50 }
 0xbed   : > { %v2061_v51 = vpop.xlane.xlu1 %2060 }
 0xbee   : > { %v2062_v62 = vmul.f32 0.0078125, %v2061_v51  ;;  %v2161_v51 = vrot.slane %v3925_v61, %v5656_v25 }
 0xbf0   : > { %v2063_v63 = vsub.f32 %v2059_v50, %v2062_v62  ;;  %v4777_v50 = vld [vmem:[#allocation8 + $0x2bc] ss:$12 sps:$4 sm:$0xff]  }
 0xbf2   : > { %v2064_v2 = vmul.f32 %v2063_v63, %v2063_v63 }
 0xbf4   : > { %2065 = vadd.xlane.f32.xlu1 %v2064_v2  ;;  %v2165_v2 = vrot.slane %v3925_v61, %v5673_v42 }
 0xc81   : > { %v2066_v22 = vpop.xlane.xlu1 %2065 }
 0xc82   : > { %v2067_v23 = vmul.f32 0.0078125, %v2066_v22 }
 0xc84   : > { %v2068_v26 = vadd.f32 1e-12, %v2067_v23 }
 0xc86   : > { %4875 = vrsqrt.f32 %v2068_v26  ;;  %v2177_v26 = vrot.slane %v3926_v20, %v5673_v42 }
 0xc90   : > { %v4876_v31 = vpop.eup %4875 }
 0xc91   : > { %v2070_v32 = vmul.f32 %v4876_v31, %v2063_v63 }
 0xc93   : > { %v2075_v34 = vmul.f32 %v2074_v30, %v2070_v32 }
 0xc95   : > { %v5767_v60 = vadd.f32 %v2079_v33, %v2075_v34 }
 0xc97   : > { %v2083_v36 = vpack.c.bf16 %v5767_v60, %v5767_v60 }
 0xc99   : > { %2345 = vmatmul.mubr.bf16.vlgmr.msra.gmra.mrb[20].mxu0 %v2083_v36  ;;  %4342 = vmatmul.mubr.bf16.vlgmr.msra.gmra.mrb[32].mxu1 %v2083_v36 }
 0xc9a   : > { %2522 = vmatpush1.bf16.msra.mxu0 %v4755_v11  ;;  %4346 = vmatpush3.bf16.msra.mxu1 %v4758_v35  ;;  %v2169_v11 = vrot.slane %v3926_v20, %v5663_v28  ;;  %v4793_v20 = vld [vmem:[#allocation10 + $0xb0] sm:$0xff]  }
 0xc9b   : > { %2523 = vmatprep.subr.bf16.mxu0 %v4761_v37  ;;  %4347 = vmatprep.subr.bf16.mxu1 %v5220_v1 }
 0xc9c   : > { %2553 = vmatprep.mubr.bf16.mxu0 %v5219_v0  ;;  %4361 = vmatprep.mubr.msk.bf16.mxu1 %vm5221_vm0, %v5220_v1 }
 0xc9e   : > { %2524 = vmatpush1.bf16.msra.mxu0 %v4759_v38  ;;  %4348 = vmatpush3.bf16.msra.mxu1 %v4762_v39 }
 0xc9f   : > { %2525 = vmatprep.subr.bf16.mxu0 %v4765_v40  ;;  %4349 = vmatprep.subr.bf16.mxu1 %v5220_v1 }
 0xca2   : > { %2526 = vmatpush1.bf16.msra.mxu0 %v4763_v12  ;;  %4350 = vmatpush3.bf16.msra.mxu1 %v4766_v43 }
 0xca3   : > { %2527 = vmatprep.subr.bf16.mxu0 %v4769_v44  ;;  %4351 = vmatprep.subr.bf16.mxu1 %v5220_v1 }
 0xca6   : > { %2528 = vmatpush1.bf16.msra.mxu0 %v4767_v45  ;;  %4352 = vmatpush3.bf16.msra.mxu1 %v4770_v46 }
 0xca7   : > { %2529 = vmatprep.subr.bf16.mxu0 %v4773_v47  ;;  %4353 = vmatprep.subr.bf16.mxu1 %v5220_v1 }
 0xcaa   : > { %2530 = vmatpush1.bf16.msra.mxu0 %v4771_v48  ;;  %4354 = vmatpush3.bf16.msra.mxu1 %v4774_v49 }
 0xcab   : > { %2531 = vmatprep.subr.bf16.mxu0 %v4777_v50  ;;  %4355 = vmatprep.subr.bf16.mxu1 %v5220_v1 }
 0xcae   : > { %2532 = vmatpush1.bf16.msra.mxu0 %v4775_v52  ;;  %4356 = vmatpush3.bf16.msra.mxu1 %v4778_v53 }
 0xcaf   : > { %2533 = vmatprep.subr.bf16.mxu0 %v4781_v54  ;;  %4357 = vmatprep.subr.bf16.mxu1 %v5220_v1 }
 0xcb2   : > { %2534 = vmatpush1.bf16.msra.mxu0 %v4779_v55  ;;  %4358 = vmatpush3.bf16.msra.mxu1 %v4782_v56 }
 0xcb3   : > { %2535 = vmatprep.subr.bf16.mxu0 %v4785_v57  ;;  %4359 = vmatprep.subr.bf16.mxu1 %v5220_v1 }
 0xcb6   : > { %2536 = vmatpush1.bf16.msra.mxu0 %v4783_v58  ;;  %4360 = vmatpush3.bf16.msra.mxu1 %v4786_v59 }
 0xcb7   : > { %4365 = vmatprep.subr.bf16.mxu0 %v5220_v1  ;;  %4371 = vmatprep.subr.bf16.mxu1 %v5220_v1 }
 0xcb9   : > { %2554 = vmatmul.mubr.bf16.vlgmr.msra.gmra.mrb[24].mxu0 %v2083_v36  ;;  %4362 = vmatmul.mubr.bf16.vlgmr.msra.gmra.mrb[36].mxu1 %v2083_v36 }
 0xcba   : > { %4367 = vmatprep.mubr.msk.bf16.mxu0 %vm5221_vm0, %v5220_v1  ;;  %4373 = vmatprep.mubr.msk.bf16.mxu1 %vm5221_vm0, %v5220_v1 }
 0xd6c   : > { %v2346_v62 = vpop.f32.mrb[20].mxu0  ;;  %v2387_v63 = vpop.f32.mrb[32].mxu1 }
 0xd6d   : > { %v2348_v4 = vpop.f32.mrb[21].mxu0  ;;  %v4343_v5 = vpop.f32.mrb[33].mxu1  ;;  %v2388_v15 = vadd.f32 %v2387_v63, %v2165_v2  ;;  %v2347_v16 = vadd.f32 %v2346_v62, %v2157_v9 }
 0xd6e   : > { %v2349_v6 = vadd.f32 %v2348_v4, %v2161_v51  ;;  %v2350_v7 = vpop.f32.mrb[22].mxu0  ;;  %v2390_v8 = vpop.f32.mrb[34].mxu1 }
 0xd6f   : > { %v2351_v10 = vpop.f32.mrb[23].mxu0  ;;  %v4344_v13 = vpop.f32.mrb[35].mxu1  ;;  %v2714_v17 = vpack.c.bf16 %v2388_v15, %v2388_v15  ;;  %v2602_v18 = vpack.c.bf16 %v2347_v16, %v2347_v16  ;;  %v4789_v15 = vld [vmem:[#allocation10 + $0x90] sm:$0xff]   ;;  %v4790_v16 = vld [vmem:[#allocation10 + $0x98] sm:$0xff]  }
 0xd70   : > { %v2604_v14 = vpack.c.bf16 %v2349_v6, %v2349_v6  ;;  %v4787_v10 = vld [vmem:[#allocation10 + $0x80] sm:$0xff]  }
 0xd71   : > { %v2720_v19 = vsel %vm1389_vm4, %v2714_v17, 0  ;;  %v4791_v17 = vld [vmem:[#allocation10 + $0xa0] sm:$0xff]  }
 0xd72   : > { %4366 = vmatpush3.bf16.xpose.msra.mxu0 %v2604_v14  ;;  %v4788_v14 = vld [vmem:[#allocation10 + $0x88] sm:$0xff]  }
 0xd73   : > { %4377 = vmatprep.subr.bf16.mxu0 %v5220_v1 }
 0xd79   : > { %4368 = vmatmul.mubr.bf16.vlgmr.msra.gmra.mrb[28].mxu0 %v2602_v18 }
 0xd7a   : > { %4378 = vmatpush3.bf16.msra.mxu0 %v2720_v19  ;;  %4379 = vmatprep.mubr.msk.bf16.mxu0 %vm5221_vm0, %v5220_v1  ;;  %v4792_v19 = vld [vmem:[#allocation10 + $0xa8] sm:$0xff]  }
 0xd7b   : > { %4389 = vmatprep.subr.bf16.mxu0 %v5220_v1 }
 0xd8c   : > { %v2555_v22 = vpop.f32.mrb[24].mxu0  ;;  %v2596_v23 = vpop.f32.mrb[36].mxu1 }
 0xd8d   : > { %v2557_v30 = vpop.f32.mrb[25].mxu0  ;;  %v4363_v31 = vpop.f32.mrb[37].mxu1  ;;  %v2597_v38 = vadd.f32 %v2596_v23, %v2177_v26  ;;  %v2556_v39 = vadd.f32 %v2555_v22, %v2169_v11  ;;  %v4794_v26 = vld [vmem:[#allocation10 + $0xb8] sm:$0xff]   ;;  %v4800_v11 = vld [vmem:[#allocation10 + $0xe8] sm:$0xff]  }
 0xd8e   : > { %v2558_v32 = vadd.f32 %v2557_v30, %v2173_v21  ;;  %v2559_v33 = vpop.f32.mrb[26].mxu0  ;;  %v2599_v34 = vpop.f32.mrb[38].mxu1  ;;  %v4795_v30 = vld [vmem:[#allocation10 + $0xc0] sm:$0xff]   ;;  %v4796_v31 = vld [vmem:[#allocation10 + $0xc8] sm:$0xff]  }
 0xd8f   : > { %v2560_v35 = vpop.f32.mrb[27].mxu0  ;;  %v4364_v36 = vpop.f32.mrb[39].mxu1  ;;  %v2715_v40 = vpack.c.bf16 %v2597_v38, %v2597_v38  ;;  %v2603_v12 = vpack.c.bf16 %v2556_v39, %v2556_v39  ;;  %v4798_v33 = vld [vmem:[#allocation10 + $0xd8] sm:$0xff]   ;;  %v4799_v34 = vld [vmem:[#allocation10 + $0xe0] sm:$0xff]  }
 0xd90   : > { %v2605_v37 = vpack.c.bf16 %v2558_v32, %v2558_v32  ;;  %v4797_v32 = vld [vmem:[#allocation10 + $0xd0] sm:$0xff]   ;;  %v4802_v36 = vld [vmem:[#allocation10 + $0xf8] sm:$0xff]  }
 0xd91   : > { %v2766_v43 = vsel %vm1389_vm4, %v2715_v40, 0  ;;  %v4801_v35 = vld [vmem:[#allocation10 + $0xf0] sm:$0xff]  }
 0xd92   : > { %4372 = vmatpush3.bf16.xpose.msra.mxu1 %v2605_v37 }
 0xd93   : > { %4383 = vmatprep.subr.bf16.mxu1 %v5220_v1 }
 0xd99   : > { %4374 = vmatmul.mubr.bf16.vlgmr.msra.gmra.mrb[40].mxu1 %v2603_v12 }
 0xd9a   : > { %4384 = vmatpush3.bf16.msra.mxu1 %v2766_v43  ;;  %4385 = vmatprep.mubr.msk.bf16.mxu1 %vm5221_vm0, %v5220_v1 }
 0xd9b   : > { %4409 = vmatprep.subr.bf16.mxu1 %v5220_v1 }
 0xe4c   : > { %v2640_v44 = vpop.f32.mrb[28].mxu0 }
 0xe4d   : > { %v2686_v45 = vmul.f32 0.125, %v2640_v44  ;;  %v4369_v46 = vpop.f32.mrb[29].mxu0 }
 0xe4e   : > { %v2643_v47 = vpop.f32.mrb[30].mxu0 }
 0xe4f   : > { %v4370_v48 = vpop.f32.mrb[31].mxu0  ;;  %v2688_v49 = vadd.f32 %v5688_v3, %v2686_v45 }
 0xe51   : > { %v2690_v50 = vsel %vm1359_vm5, %v2688_v49, -inf }
 0xe52   : > { %2691 = vmax.xlane.f32.xlu0 %v2690_v50 }
 0xe6c   : > { %v2680_v52 = vpop.f32.mrb[40].mxu1 }
 0xe6d   : > { %v2687_v53 = vmul.f32 0.125, %v2680_v52  ;;  %v4375_v54 = vpop.f32.mrb[41].mxu1 }
 0xe6e   : > { %v2683_v55 = vpop.f32.mrb[42].mxu1 }
 0xe6f   : > { %v4376_v56 = vpop.f32.mrb[43].mxu1  ;;  %v2689_v57 = vadd.f32 %v5688_v3, %v2687_v53  ;;  %v5839_v53 = vld [vmem:[%s6006_s28 + $0x8] sm:$0xff] }
 0xe70   : > { %v3023_v54 = vrot.slane %v5839_v53, %v5663_v28 }
 0xe71   : > { %v2693_v58 = vsel %vm1359_vm5, %v2689_v57, -inf }
 0xe72   : > { %2694 = vmax.xlane.f32.xlu1 %v2693_v58 }
 0xedf   : > { %v2692_v59 = vpop.xlane.xlu0 %2691 }
 0xee0   : > { %v2696_v61 = vsub.f32 %v2688_v49, %v2692_v59 }
 0xee2   : > { %v2698_v51 = vmul.f32 1.442695, %v2696_v61 }
 0xee4   : > { %4877 = vpow2.f32 %v2698_v51  ;;  %v4803_v51 = vld [vmem:[#allocation11 + $0x80] ss:$8 sps:$4 sm:$0xff]  }
 0xeee   : > { %v4878_v62 = vpop.eup %4877 }
 0xeef   : > { %v2702_v63 = vsel %vm1359_vm5, %v4878_v62, 0.0 }
 0xef0   : > { %2703 = vadd.xlane.f32.xlu0 %v2702_v63  ;;  %v4808_v63 = vld [vmem:[#allocation11 + $0x94] ss:$8 sps:$4 sm:$0xff]  }
 0xeff   : > { %v2695_v2 = vpop.xlane.xlu1 %2694 }
 0xf00   : > { %v2697_v4 = vsub.f32 %v2689_v57, %v2695_v2  ;;  %v4806_v2 = vld [vmem:[#allocation11 + $0x90] ss:$8 sps:$4 sm:$0xff]  }
 0xf02   : > { %v2700_v5 = vmul.f32 1.442695, %v2697_v4  ;;  %v4811_v4 = vld [vmem:[#allocation11 + $0xa4] ss:$8 sps:$4 sm:$0xff]  }
 0xf04   : > { %4879 = vpow2.f32 %v2700_v5  ;;  %v4809_v5 = vld [vmem:[#allocation11 + $0xa0] ss:$8 sps:$4 sm:$0xff]  }
 0xf0e   : > { %v4880_v6 = vpop.eup %4879 }
 0xf0f   : > { %v2705_v7 = vsel %vm1359_vm5, %v4880_v6, 0.0 }
 0xf10   : > { %2706 = vadd.xlane.f32.xlu1 %v2705_v7 }
 0xf7d   : > { %v2704_v3 = vpop.xlane.xlu0 %2703 }
 0xf7e   : > { %4881 = vrcp.f32 %v2704_v3 }
 0xf88   : > { %v4882_v8 = vpop.eup %4881 }
 0xf89   : > { %v2709_v9 = vmul.f32 %v4882_v8, %v4878_v62  ;;  %v4805_v62 = vld [vmem:[#allocation11 + $0x84] ss:$8 sps:$4 sm:$0xff]  }
 0xf8b   : > { %v2712_v13 = vpack.c.bf16 %v2709_v9, %v2709_v9  ;;  %v4814_v9 = vld [vmem:[#allocation11 + $0xb4] ss:$8 sps:$4 sm:$0xff]  }
 0xf8d   : > { %4380 = vmatmul.mubr.msk.bf16.vlgmr.msra.gmra.mrb[32].mxu0 %vm1359_vm5, %v2712_v13  ;;  %v4815_v13 = vld [vmem:[#allocation11 + $0xc0] ss:$8 sps:$4 sm:$0xff]  }
 0xf8e   : > { %4390 = vmatpush3.bf16.msra.mxu0 %v4787_v10  ;;  %4405 = vmatprep.mubr.msk.bf16.mxu0 %vm5221_vm0, %v5220_v1  ;;  %v4817_v10 = vld [vmem:[#allocation11 + $0xc4] ss:$8 sps:$4 sm:$0xff]  }
 0xf8f   : > { %4391 = vmatprep.subr.bf16.mxu0 %v5220_v1 }
 0xf92   : > { %4392 = vmatpush3.bf16.msra.mxu0 %v4788_v14  ;;  %v4820_v14 = vld [vmem:[#allocation11 + $0xd4] ss:$8 sps:$4 sm:$0xff]  }
 0xf93   : > { %4393 = vmatprep.subr.bf16.mxu0 %v5220_v1 }
 0xf96   : > { %4394 = vmatpush3.bf16.msra.mxu0 %v4789_v15  ;;  %v4818_v15 = vld [vmem:[#allocation11 + $0xd0] ss:$8 sps:$4 sm:$0xff]  }
 0xf97   : > { %4395 = vmatprep.subr.bf16.mxu0 %v5220_v1 }
 0xf9a   : > { %4396 = vmatpush3.bf16.msra.mxu0 %v4790_v16  ;;  %v4823_v16 = vld [vmem:[#allocation11 + $0xe4] ss:$8 sps:$4 sm:$0xff]  }
 0xf9b   : > { %4397 = vmatprep.subr.bf16.mxu0 %v5220_v1 }
 0xf9d   : > { %v2707_v18 = vpop.xlane.xlu1 %2706 }
 0xf9e   : > { %4883 = vrcp.f32 %v2707_v18  ;;  %4398 = vmatpush3.bf16.msra.mxu0 %v4791_v17  ;;  %v4821_v17 = vld [vmem:[#allocation11 + $0xe0] ss:$8 sps:$4 sm:$0xff]   ;;  %v4826_v18 = vld [vmem:[#allocation11 + $0xf4] ss:$8 sps:$4 sm:$0xff]  }
 0xf9f   : > { %4399 = vmatprep.subr.bf16.mxu0 %v5220_v1 }
 0xfa2   : > { %4400 = vmatpush3.bf16.msra.mxu0 %v4792_v19  ;;  %v4824_v19 = vld [vmem:[#allocation11 + $0xf0] ss:$8 sps:$4 sm:$0xff]  }
 0xfa3   : > { %4401 = vmatprep.subr.bf16.mxu0 %v5220_v1 }
 0xfa6   : > { %4402 = vmatpush3.bf16.msra.mxu0 %v4793_v20 }
 0xfa7   : > { %4403 = vmatprep.subr.bf16.mxu0 %v5220_v1 }
 0xfa8   : > { %v4884_v21 = vpop.eup %4883 }
 0xfa9   : > { %v2711_v22 = vmul.f32 %v4884_v21, %v4880_v6 }
 0xfaa   : > { %4404 = vmatpush3.bf16.msra.mxu0 %v4794_v26 }
 0xfab   : > { %v2713_v23 = vpack.c.bf16 %v2711_v22, %v2711_v22  ;;  %3158 = vmatprep.subr.bf16.mxu0 %v4805_v62 }
 0xfad   : > { %4386 = vmatmul.mubr.msk.bf16.vlgmr.msra.gmra.mrb[44].mxu1 %vm1359_vm5, %v2713_v23  ;;  %v3040_v23 = vrot.slane %v5839_v53, %v5656_v25 }
 0xfae   : > { %4425 = vmatprep.mubr.msk.bf16.mxu1 %vm5221_vm0, %v5220_v1  ;;  %4410 = vmatpush3.bf16.msra.mxu1 %v4795_v30 }
 0xfaf   : > { %4411 = vmatprep.subr.bf16.mxu1 %v5220_v1 }
 0xfb2   : > { %4412 = vmatpush3.bf16.msra.mxu1 %v4796_v31  ;;  %v3045_v31 = vrot.slane %v5839_v53, %v5673_v42  ;;  %v4832_v42 = vld [vmem:[#allocation13 + $0x90] sm:$0xff]  }
 0xfb3   : > { %4413 = vmatprep.subr.bf16.mxu1 %v5220_v1 }
 0xfb6   : > { %4414 = vmatpush3.bf16.msra.mxu1 %v4797_v32 }
 0xfb7   : > { %4415 = vmatprep.subr.bf16.mxu1 %v5220_v1 }
 0xfba   : > { %4416 = vmatpush3.bf16.msra.mxu1 %v4798_v33 }
 0xfbb   : > { %4417 = vmatprep.subr.bf16.mxu1 %v5220_v1 }
 0xfbe   : > { %4418 = vmatpush3.bf16.msra.mxu1 %v4799_v34 }
 0xfbf   : > { %4419 = vmatprep.subr.bf16.mxu1 %v5220_v1 }
 0xfc2   : > { %4420 = vmatpush3.bf16.msra.mxu1 %v4800_v11  ;;  %v4827_v11 = vld [vmem:[#allocation13 + $0xc0] sm:$0xff]  }
 0xfc3   : > { %4421 = vmatprep.subr.bf16.mxu1 %v5220_v1 }
 0xfc6   : > { %4422 = vmatpush3.bf16.msra.mxu1 %v4801_v35  ;;  %v4828_v35 = vld [vmem:[#allocation13 + $0x80] sm:$0xff]  }
 0xfc7   : > { %4423 = vmatprep.subr.bf16.mxu1 %v5220_v1 }
 0xfca   : > { %4424 = vmatpush3.bf16.msra.mxu1 %v4802_v36  ;;  %v4829_v36 = vld [vmem:[#allocation13 + $0xc8] sm:$0xff]  }
 0xfcb   : > { %4163 = vmatprep.subr.bf16.mxu1 %v4827_v11 }
0x1060   : > { %v2756_v37 = vpop.f32.mrb[32].mxu0 }
0x1061   : > { %v2808_v38 = vpack.c.bf16 %v2756_v37, %v2756_v37  ;;  %v4381_v39 = vpop.f32.mrb[33].mxu0  ;;  %v4830_v37 = vld [vmem:[#allocation13 + $0x88] sm:$0xff]  }
0x1062   : > { %v2759_v40 = vpop.f32.mrb[34].mxu0  ;;  %v4833_v39 = vld [vmem:[#allocation13 + $0xd8] sm:$0xff]  }
0x1063   : > { %v4382_v12 = vpop.f32.mrb[35].mxu0  ;;  %4406 = vmatmul.mubr.bf16.vlgmr.msra.gmra.mrb[36].mxu0 %v2808_v38  ;;  %v4831_v38 = vld [vmem:[#allocation13 + $0xd0] sm:$0xff]   ;;  %v4834_v40 = vld [vmem:[#allocation13 + $0x98] sm:$0xff]  }
0x1064   : > { %3190 = vmatprep.mubr.bf16.mxu0 %v5219_v0  ;;  %3159 = vmatpush1.bf16.msra.mxu0 %v4803_v51  ;;  %v4835_v12 = vld [vmem:[#allocation13 + $0xe0] sm:$0xff]  }
0x1065   : > { %3160 = vmatprep.subr.bf16.mxu0 %v4808_v63 }
0x1068   : > { %3161 = vmatpush1.bf16.msra.mxu0 %v4806_v2 }
0x1069   : > { %3162 = vmatprep.subr.bf16.mxu0 %v4811_v4 }
0x106c   : > { %3163 = vmatpush1.bf16.msra.mxu0 %v4809_v5 }
0x106d   : > { %3164 = vmatprep.subr.bf16.mxu0 %v4814_v9 }
0x1080   : > { %v2802_v43 = vpop.f32.mrb[44].mxu1 }
0x1081   : > { %v2809_v44 = vpack.c.bf16 %v2802_v43, %v2802_v43  ;;  %v4387_v45 = vpop.f32.mrb[45].mxu1  ;;  %v4836_v43 = vld [vmem:[#allocation13 + $0xa0] sm:$0xff]  }
0x1082   : > { %v2805_v46 = vpop.f32.mrb[46].mxu1  ;;  %v4838_v45 = vld [vmem:[#allocation13 + $0xa8] sm:$0xff]  }
0x1083   : > { %v4388_v47 = vpop.f32.mrb[47].mxu1  ;;  %4426 = vmatmul.mubr.bf16.vlgmr.msra.gmra.mrb[48].mxu1 %v2809_v44  ;;  %v4837_v44 = vld [vmem:[#allocation13 + $0xe8] sm:$0xff]   ;;  %v4839_v46 = vld [vmem:[#allocation13 + $0xf0] sm:$0xff]  }
0x1084   : > { %4164 = vmatpush3.bf16.msra.mxu1 %v4828_v35  ;;  %v4840_v47 = vld [vmem:[#allocation13 + $0xb0] sm:$0xff]  }
0x1085   : > { %4165 = vmatprep.subr.bf16.mxu1 %v4829_v36  ;;  %v4845_v35 = vld [vmem:[#allocation14 + $0x10] sm:$0xff]   ;;  %v4846_v36 = vld [vmem:[#allocation14 + $0x18] sm:$0xff]  }
0x1088   : > { %4166 = vmatpush3.bf16.msra.mxu1 %v4830_v37  ;;  %v4848_v37 = vld [vmem:[#allocation14 + $0x28] sm:$0xff]  }
0x1089   : > { %4167 = vmatprep.subr.bf16.mxu1 %v4831_v38  ;;  %v4849_v38 = vld [vmem:[#allocation14 + $0x30] sm:$0xff]  }
0x108c   : > { %4168 = vmatpush3.bf16.msra.mxu1 %v4832_v42  ;;  %v4850_v42 = vld [vmem:[#allocation14 + $0x38] sm:$0xff]  }
0x108d   : > { %4169 = vmatprep.subr.bf16.mxu1 %v4833_v39  ;;  %v4851_v39 = vld [vmem:[#allocation14 + $0x40] sm:$0xff]  }
0x1090   : > { %4170 = vmatpush3.bf16.msra.mxu1 %v4834_v40  ;;  %v4852_v40 = vld [vmem:[#allocation14 + $0x48] sm:$0xff]  }
0x1091   : > { %4171 = vmatprep.subr.bf16.mxu1 %v4835_v12  ;;  %v4853_v12 = vld [vmem:[#allocation14 + $0x50] sm:$0xff]  }
0x1094   : > { %4172 = vmatpush3.bf16.msra.mxu1 %v4836_v43  ;;  %v4854_v43 = vld [vmem:[#allocation14 + $0x58] sm:$0xff]  }
0x1095   : > { %4173 = vmatprep.subr.bf16.mxu1 %v4837_v44 }
0x1098   : > { %4174 = vmatpush3.bf16.msra.mxu1 %v4838_v45 }
0x1099   : > { %4175 = vmatprep.subr.bf16.mxu1 %v4839_v46 }
0x109c   : > { %4176 = vmatpush3.bf16.msra.mxu1 %v4840_v47  ;;  %v3407_v47 = vrot.slane %v5839_v53, %v2073_v27  ;;  %v4858_v27 = vld [vmem:[#allocation14 + $0x78] sm:$0xff]  }
0x1136   : > { %v2925_v48 = vpop.f32.mrb[36].mxu0 }
0x1137   : > { %v4407_v49 = vpop.f32.mrb[37].mxu0 }
0x1138   : > { %v2928_v50 = vpop.f32.mrb[38].mxu0  ;;  %v4842_v49 = vld [vmem:[#allocation13 + $0xb8] sm:$0xff]  }
0x1139   : > { %v4408_v52 = vpop.f32.mrb[39].mxu0  ;;  %v3993_v50 = vld [vmem:[%s6007_s14 + $0x2] sm:$0x3] }
0x113a   : > { %v3071_v52 = vrot.slane %v3993_v50, %v5663_v28 }
0x1156   : > { %v3013_v55 = vpop.f32.mrb[48].mxu1 }
0x1157   : > { %v3019_v0 = vadd.f32 %v3013_v55, %v2925_v48  ;;  %v4427_v56 = vpop.f32.mrb[49].mxu1  ;;  %v4841_v48 = vld [vmem:[#allocation13 + $0xf8] sm:$0xff]  }
0x1158   : > { %v3016_v57 = vpop.f32.mrb[50].mxu1  ;;  %4177 = vmatprep.subr.bf16.mxu1 %v4841_v48 }
0x1159   : > { %v3024_v58 = vadd.f32 %v3023_v54, %v3019_v0  ;;  %v4428_v59 = vpop.f32.mrb[51].mxu1  ;;  %4178 = vmatpush3.bf16.msra.mxu1 %v4842_v49  ;;  %v3075_v54 = vrot.slane %v3993_v50, %v5656_v25  ;;  %v3412_v50 = vrot.slane %v5839_v53, %v2078_v29 }
0x115a   : > { %4449 = vmatprep.subr.bf16.mxu1 %v5220_v1 }
0x115b   : > { %v3025_v61 = vadd.f32 %v3024_v58, %v5767_v60  ;;  %v4812_v60 = vld [vmem:[#allocation11 + $0xb0] ss:$8 sps:$4 sm:$0xff]  }
0x115c   : > { %3165 = vmatpush1.bf16.msra.mxu0 %v4812_v60 }
0x115d   : > { %3026 = vadd.xlane.f32.xlu0 %v3025_v61  ;;  %3166 = vmatprep.subr.bf16.mxu0 %v4817_v10 }
0x1160   : > { %3167 = vmatpush1.bf16.msra.mxu0 %v4815_v13 }
0x1161   : > { %3168 = vmatprep.subr.bf16.mxu0 %v4820_v14 }
0x1164   : > { %3169 = vmatpush1.bf16.msra.mxu0 %v4818_v15 }
0x1165   : > { %3170 = vmatprep.subr.bf16.mxu0 %v4823_v16 }
0x1168   : > { %3171 = vmatpush1.bf16.msra.mxu0 %v4821_v17 }
0x1169   : > { %3172 = vmatprep.subr.bf16.mxu0 %v4826_v18  ;;  %v3255_v18 = vrot.slane %v5839_v53, %v1921_v41 }
0x116c   : > { %3173 = vmatpush1.bf16.msra.mxu0 %v4824_v19 }
0x116d   : > { %4429 = vmatprep.subr.bf16.mxu0 %v5220_v1 }
0x11ea   : > { %v3027_v6 = vpop.xlane.xlu0 %3026 }
0x11eb   : > { %v3028_v7 = vmul.f32 0.0078125, %v3027_v6 }
0x11ed   : > { %v3029_v3 = vsub.f32 %v3025_v61, %v3028_v7 }
0x11ef   : > { %v3030_v8 = vmul.f32 %v3029_v3, %v3029_v3 }
0x11f1   : > { %3031 = vadd.xlane.f32.xlu1 %v3030_v8 }
0x127e   : > { %v3032_v20 = vpop.xlane.xlu1 %3031 }
0x127f   : > { %v3033_v21 = vmul.f32 0.0078125, %v3032_v20 }
0x1281   : > { %v3034_v22 = vadd.f32 1e-12, %v3033_v21 }
0x1283   : > { %4885 = vrsqrt.f32 %v3034_v22 }
0x128d   : > { %v4886_v26 = vpop.eup %4885 }
0x128e   : > { %v3036_v30 = vmul.f32 %v4886_v26, %v3029_v3 }
0x1290   : > { %v3041_v32 = vmul.f32 %v3040_v23, %v3036_v30  ;;  %v4843_v30 = vld [vmem:[#allocation14] sm:$0xff]  }
0x1292   : > { %v5849_v33 = vadd.f32 %v3045_v31, %v3041_v32  ;;  %v4844_v31 = vld [vmem:[#allocation14 + $0x8] sm:$0xff]  }
0x1294   : > { %v3047_v34 = vpack.c.bf16 %v5849_v33, %v5849_v33 }
0x1296   : > { %3191 = vmatmul.mubr.bf16.vlgmr.msra.gmra.mrb[40].mxu0 %v3047_v34 }
0x1297   : > { %4445 = vmatprep.mubr.msk.bf16.mxu0 %vm5221_vm0, %v5220_v1  ;;  %4430 = vmatpush3.bf16.msra.mxu0 %v4843_v30 }
0x1298   : > { %4431 = vmatprep.subr.bf16.mxu0 %v5220_v1 }
0x129b   : > { %4432 = vmatpush3.bf16.msra.mxu0 %v4844_v31 }
0x129c   : > { %4433 = vmatprep.subr.bf16.mxu0 %v5220_v1 }
0x129f   : > { %4434 = vmatpush3.bf16.msra.mxu0 %v4845_v35 }
0x12a0   : > { %4435 = vmatprep.subr.bf16.mxu0 %v5220_v1 }
0x12a3   : > { %4436 = vmatpush3.bf16.msra.mxu0 %v4846_v36 }
0x12a4   : > { %4437 = vmatprep.subr.bf16.mxu0 %v5220_v1 }
0x1369   : > { %v3192_v55 = vpop.f32.mrb[40].mxu0 }
0x136a   : > { %v3193_v0 = vadd.f32 %v3192_v55, %v3071_v52  ;;  %v3194_v56 = vpop.f32.mrb[41].mxu0 }
0x136b   : > { %v3195_v57 = vadd.f32 %v3194_v56, %v3075_v54  ;;  %v3196_v58 = vpop.f32.mrb[42].mxu0  ;;  %v4856_v56 = vld [vmem:[#allocation14 + $0x68] sm:$0xff]  }
0x136c   : > { %v3201_v59 = vmul.f32 0.044715, %v3193_v0  ;;  %v3197_v61 = vpop.f32.mrb[43].mxu0  ;;  %v3199_v8 = vmul.f32 0.5, %v3193_v0 }
0x136d   : > { %v3202_v51 = vmul.f32 0.044715, %v3195_v57  ;;  %v3200_v60 = vmul.f32 0.5, %v3195_v57 }
0x136e   : > { %v3203_v62 = vmul.f32 %v3201_v59, %v3193_v0 }
0x136f   : > { %v3204_v63 = vmul.f32 %v3202_v51, %v3195_v57  ;;  %v3521_v51 = vld [vmem:[%s609_s26] sm:$0x1]  ;;  %s5222_s26 = smov [#allocation16]  }
0x1370   : > { %v3205_v2 = vmul.f32 %v3203_v62, %v3193_v0  ;;  %s5125_s18 = sshll.u32 %s5222_s26, 4  ;;  %s5126_s18 = int_to_ptr.vmem [resolvable:$false] %s5125_s18 }
0x1371   : > { %v3206_v4 = vmul.f32 %v3204_v63, %v3195_v57  ;;  %s5127_s0 = scalar_lea.vmem %s5126_s18, 32  ;;  %p5128_p3 = scmp.lt.s32.totalorder %s5904_s8, %s5126_s18 }
0x1372   : > { %v3207_v5 = vadd.f32 %v3205_v2, %v3193_v0  ;;  %v4855_v0 = vld [vmem:[#allocation14 + $0x60] sm:$0xff]   ;;  %v3541_v2 = vld [vmem:[%s6004_s4 + $0x3] sm:$0x1]  ;;  %p5129_p6 = scmp.lt.s32.totalorder %s5127_s0, %s5121_s19 }
0x1373   : > { %v3208_v6 = vadd.f32 %v3206_v4, %v3195_v57  ;;  %v4857_v57 = vld [vmem:[#allocation14 + $0x70] sm:$0xff]  }
0x1374   : > { %v3209_v7 = vmul.f32 0.7978846, %v3207_v5  ;;  %p5130_p9 = por %p5129_p6, %p5128_p3 }
0x1375   : > { %v3210_v3 = vmul.f32 0.7978846, %v3208_v6 }
0x1376   : > { %4887 = vtanh.f32 %v3209_v7  ;;  %p5131_p4 = pnand %p5130_p9, %p5124_p13 }
0x1377   : > { %4889 = vtanh.f32 %v3210_v3 }
0x1380   : > { %v4888_v28 = vpop.eup %4887 }
0x1381   : > { %v4890_v25 = vpop.eup %4889  ;;  %v3213_v9 = vadd.f32 1.0, %v4888_v28 }
0x1382   : > { %v3214_v10 = vadd.f32 1.0, %v4890_v25 }
0x1383   : > { %v3215_v13 = vmul.f32 %v3213_v9, %v3199_v8 }
0x1384   : > { %v3216_v14 = vmul.f32 %v3214_v10, %v3200_v60 }
0x1385   : > { %v3217_v16 = vpack.c.bf16 %v3215_v13, %v3215_v13 }
0x1386   : > { %v3218_v15 = vpack.c.bf16 %v3216_v14, %v3216_v14 }
0x1388   : > { %3384 = vmatprep.mubr.bf16.mxu1 %v3218_v15 }
0x1389   : > { %3385 = vmatmul.mubr.bf16.vlgmr.msra.gmra.mrb[52].mxu1 %v3217_v16 }
0x138a   : > { %4465 = vmatprep.mubr.msk.bf16.mxu1 %vm5221_vm0, %v5220_v1  ;;  %4450 = vmatpush3.bf16.msra.mxu1 %v4851_v39 }
0x138b   : > { %4451 = vmatprep.subr.bf16.mxu1 %v5220_v1 }
0x138e   : > { %4452 = vmatpush3.bf16.msra.mxu1 %v4852_v40 }
0x138f   : > { %4453 = vmatprep.subr.bf16.mxu1 %v5220_v1 }
0x1392   : > { %4454 = vmatpush3.bf16.msra.mxu1 %v4853_v12 }
0x1393   : > { %4455 = vmatprep.subr.bf16.mxu1 %v5220_v1 }
0x1396   : > { %4456 = vmatpush3.bf16.msra.mxu1 %v4854_v43 }
0x1397   : > { %4457 = vmatprep.subr.bf16.mxu1 %v5220_v1 }
0x139a   : > { %4458 = vmatpush3.bf16.msra.mxu1 %v4855_v0 }
0x139b   : > { %4459 = vmatprep.subr.bf16.mxu1 %v5220_v1 }
0x139e   : > { %4460 = vmatpush3.bf16.msra.mxu1 %v4856_v56 }
0x139f   : > { %4461 = vmatprep.subr.bf16.mxu1 %v5220_v1 }
0x13a2   : > { %4462 = vmatpush3.bf16.msra.mxu1 %v4857_v57 }
0x13a3   : > { %4463 = vmatprep.subr.bf16.mxu1 %v5220_v1 }
0x13a6   : > { %4464 = vmatpush3.bf16.msra.mxu1 %v4858_v27 }
0x145c   : > { %v4179_v17 = vpop.f32.mrb[52].mxu1 }
0x145d   : > { %v4180_v19 = vpop.f32.mrb[53].mxu1 }
0x145e   : > { %v4181_v20 = vadd.f32 %v4180_v19, %v4179_v17  ;;  %v4182_v21 = vpop.f32.mrb[54].mxu1 }
0x145f   : > { %v4183_v22 = vpop.f32.mrb[55].mxu1 }
0x1460   : > { %v3387_v23 = vadd.f32 %v4181_v20, %v3255_v18 }
0x1462   : > { %v3392_v26 = vadd.f32 %v3387_v23, %v5849_v33  ;;  %v4847_v33 = vld [vmem:[#allocation14 + $0x20] sm:$0xff]  }
0x1463   : > { %4438 = vmatpush3.bf16.msra.mxu0 %v4847_v33 }
0x1464   : > { %3393 = vadd.xlane.f32.xlu0 %v3392_v26  ;;  %4439 = vmatprep.subr.bf16.mxu0 %v5220_v1 }
0x1467   : > { %4440 = vmatpush3.bf16.msra.mxu0 %v4848_v37 }
0x1468   : > { %4441 = vmatprep.subr.bf16.mxu0 %v5220_v1 }
0x146b   : > { %4442 = vmatpush3.bf16.msra.mxu0 %v4849_v38 }
0x146c   : > { %4443 = vmatprep.subr.bf16.mxu0 %v5220_v1 }
0x146f   : > { %4444 = vmatpush3.bf16.msra.mxu0 %v4850_v42 }
0x14f1   : > { %v3394_v32 = vpop.xlane.xlu0 %3393 }
0x14f2   : > { %v3395_v34 = vmul.f32 0.0078125, %v3394_v32 }
0x14f4   : > { %v3396_v11 = vsub.f32 %v3392_v26, %v3395_v34 }
0x14f6   : > { %v3397_v41 = vmul.f32 %v3396_v11, %v3396_v11 }
0x14f8   : > { %3398 = vadd.xlane.f32.xlu1 %v3397_v41 }
0x1585   : > { %v3399_v44 = vpop.xlane.xlu1 %3398 }
0x1586   : > { %v3400_v45 = vmul.f32 0.0078125, %v3399_v44 }
0x1588   : > { %v3401_v46 = vadd.f32 1e-12, %v3400_v45 }
0x158a   : > { %4891 = vrsqrt.f32 %v3401_v46 }
0x1594   : > { %v4892_v48 = vpop.eup %4891 }
0x1595   : > { %v3403_v49 = vmul.f32 %v4892_v48, %v3396_v11 }
0x1597   : > { %v3408_v52 = vmul.f32 %v3407_v47, %v3403_v49 }
0x1599   : > { %v3413_v54 = vadd.f32 %v3412_v50, %v3408_v52 }
0x159b   : > { %v3414_v55 = vpack.c.bf16 %v3413_v54, %v3413_v54 }
0x159d   : > { %4446 = vmatmul.mubr.bf16.vlgmr.msra.gmra.mrb[44].mxu0 %v3414_v55 }
0x1670   : > { %v3514_v29 = vpop.f32.mrb[44].mxu0 }
0x1671   : > { %v3515_v53 = vadd.f32 %v3514_v29, %v3431_v24  ;;  %v4447_v58 = vpop.f32.mrb[45].mxu0 }
0x1672   : > { %v3517_v59 = vpop.f32.mrb[46].mxu0 }
0x1673   : > { %4893 = vtanh.f32 %v3515_v53  ;;  %v4448_v61 = vpop.f32.mrb[47].mxu0 }
0x167d   : > { %v4894_v62 = vpop.eup %4893 }
0x167e   : > { %v3522_v1 = vmul.f32 %v4894_v62, %v3521_v51 }
0x1680   : > { %v3523_v63 = vpack.c.bf16 %v3522_v1, %v3522_v1 }
0x1682   : > { %4466 = vmatmul.mubr.bf16.vlgmr.msra.gmra.mrb[56].mxu1 %v3523_v63 }
0x1755   : > { %v3624_v4 = vpop.f32.mrb[56].mxu1 }
0x1756   : > { %v3625_v5 = vadd.f32 %v3624_v4, %v3541_v2  ;;  %v4467_v6 = vpop.f32.mrb[57].mxu1 }
0x1757   : > { %v3627_v7 = vpop.f32.mrb[58].mxu1 }
0x1758   : > { %3630 = vst [vmem:[%s602_s22] sm:$0x1] %v3625_v5  ;;  %v4468_v3 = vpop.f32.mrb[59].mxu1 }
0x1759   : > { %5134 = shalt.err (!%p5131_p4)
}
0x175a   : > { %s5135_s24 = scalar_lea.hbm %s5902_s23, 16  ;;  %s5139_s22 = scalar_lea.hbm %s6009_s20, 32 }
0x175b   : > { %p5136_p8 = scmp.ne.s32.totalorder %s5902_s23, %s5135_s24  ;;  %p5140_p2 = scmp.lt.u32.totalorder %s5902_s23, %s6009_s20 }
0x175c   : > { %p5141_p7 = scmp.lt.u32.totalorder %s5139_s22, %s5135_s24  ;;  %p5143_p1 = scmp.lt.u32.totalorder %s5135_s24, %s5902_s23 }
0x175d   : > { %p5137_p0 = pnand %p5136_p8, %p6010_p11 }
0x175e   : > { %p5142_p10 = por %p5141_p7, %p5140_p2 }
0x175f   : > { %p5138_p5 = pneg %p5137_p0 }
0x1760   : > { %p5144_p12 = por %p5143_p1, %p5142_p10 }
0x1762   : > { %p5145_p13 = pnand %p5144_p12, %p5138_p5 }
0x1764   : > { %5148 = shalt.err (!%p5145_p13)
}
0x1765   : > { %4499 = dma.vmem_to_hbm [thread:$0]  (%p6010_p11), %s5904_s8, 16, %s5902_s23, %s3632_s25  }
0x1766 PF: > { %s3656_s19 = sand.u32 1, %s5191_s29   ;;  %p6011_p3 = scmp.ne.s32.totalorder %s5992_s2, 0 }
0x1767   : > { %p6012_p6 = scmp.ge.s32.totalorder %s5203_s16, 2  ;;  %s3657_s18 = scalar_lea.sflag [#allocation4], %s3656_s19 }
0x1769   : > { %p4528_p9 = pnand %p6012_p6, %p6011_p3 }
0x176b   : > { %5186 = dma.done.wait (!%p4528_p9), %s3657_s18, 16  }
0x176c   : > { %5188 = vsyncadd (!%p4528_p9), %s3657_s18, 4294967280  ;;  %p31_p4 = scmp.ge.s32.totalorder %s5500_s21, 4   ;;  %s6013_s29 = smov %s5195_s30 }
0x176d   : > { %s6014_s30 = smov %s5199_s15  ;;  %s6015_s15 = smov %s5512_s10 }
0x176e   : > { %s6016_s16 = smov %s5500_s21  ;;  %33 = sbr.rel (!%p31_p4) target bundleno = 19 (0x13), region = 163 }
0x1775   :  { %3661 = vsyncpa [#allocation3], 1 }
0x1776   :  { %3663 = vsyncpa [#allocation3 + $0x1], 1 }
0x1777   :  { %3664 = vsyncpa [#allocation6], 1 }
0x1778   :  { %3665 = vsyncpa [#allocation9], 1 }
0x1779   :  { %3666 = vsyncpa [#allocation12], 1 }
0x177a   :  { %3667 = vsyncpa [#allocation15], 1 }
0x177b   :  { %3668 = vsyncpa [#allocation4], 1 }
0x177c   :  { %3670 = vsyncpa [#allocation4 + $0x1], 1 }

</bundles_post_ra>
